<compile_context>
chip_gen: v6e
topology: v6e:2x2x1
jax: 0.10.0
libtpu: 0.0.40
codegen_flags: <defaults>
</compile_context>

<pallas_src>
import functools

import jax
import jax.numpy as jnp
from jax.experimental import pallas as pl
from jax.experimental.pallas import tpu as pltpu

VMEM_LIMIT = 48 * 1024 * 1024  # safe on v5e/v6e (128 MiB) and v7x (64 MiB)


def _round_up(x, m):
    return (x + m - 1) // m * m


# ----------------------------------------------------------------------------
# Pallas kernels
# ----------------------------------------------------------------------------
def conv_stats_kernel(w_ref, p_ref, y_ref, sum_ref, sq_ref):
    """Pass 1: conv-as-matmul tile + per-channel sum / sum-of-squares accum."""
    @pl.when(pl.program_id(0) == 0)
    def _():
        sum_ref[...] = jnp.zeros_like(sum_ref)
        sq_ref[...] = jnp.zeros_like(sq_ref)

    y = jnp.dot(w_ref[...], p_ref[...],
                preferred_element_type=jnp.float32)          # (Cout, Mt) f32
    sum_ref[...] += jnp.sum(y, axis=1, keepdims=True)
    sq_ref[...] += jnp.sum(y * y, axis=1, keepdims=True)
    y_ref[...] = y.astype(y_ref.dtype)                       # bf16 store


def bn_relu_kernel(y_ref, sum_ref, sq_ref, gamma_ref, beta_ref, out_ref, *,
                   inv_count):
    """Pass 2: normalize with global batch stats, scale/shift, ReLU (f32 math)."""
    y = y_ref[...].astype(jnp.float32)
    mean = sum_ref[...] * inv_count
    var = jnp.maximum(sq_ref[...] * inv_count - mean * mean, 0.0)
    scale = gamma_ref[...] * jax.lax.rsqrt(var + 1e-5)
    out = (y - mean) * scale + beta_ref[...]
    out_ref[...] = jnp.maximum(out, 0.0).astype(out_ref.dtype)


def matmul_bias_kernel(x_ref, w_ref, b_ref, out_ref):
    """out = x @ w + b  (bf16 operands, f32 accumulation)."""
    out_ref[...] = (jnp.dot(x_ref[...], w_ref[...],
                            preferred_element_type=jnp.float32) + b_ref[...])


def gru_rec_kernel(gx_ref, whh_ref, bhh_ref, h_ref):
    """Serial GRU recurrence over T with a precomputed input projection.

    gx_ref : (T, N, 3*Hp)  x @ W_ih^T + b_ih, gate g at lane offset g*Hp.
    whh_ref: (Hp, 3*Hp) (rows >= H are zero), bhh_ref: (1, 3*Hp).
    h_ref (out): (N, Hp) — real hidden state in lanes [0, H).
    """
    T = gx_ref.shape[0]
    N, Hp = h_ref.shape
    whh_bf = whh_ref[...].astype(jnp.bfloat16)   # hoisted out of the loop
    bhh = bhh_ref[...]

    def step(t, h):
        gx = gx_ref[t]                                        # (N, 3*Hp) f32
        gh = jnp.dot(h.astype(jnp.bfloat16), whh_bf,
                     preferred_element_type=jnp.float32) + bhh
        # PyTorch gate order: r, z, n ;  n = tanh(gx_n + r * (W_hn h + b_hn))
        r = jax.nn.sigmoid(gx[:, 0:Hp] + gh[:, 0:Hp])
        z = jax.nn.sigmoid(gx[:, Hp:2 * Hp] + gh[:, Hp:2 * Hp])
        n = jnp.tanh(gx[:, 2 * Hp:3 * Hp] + r * gh[:, 2 * Hp:3 * Hp])
        return (1.0 - z) * n + z * h

    h_ref[...] = jax.lax.fori_loop(0, T, step,
                                   jnp.zeros((N, Hp), jnp.float32), unroll=2)


# ----------------------------------------------------------------------------
# Glue (channel-major im2col, wrappers)
# ----------------------------------------------------------------------------
def im2col_cm(x_cnhw, ksize=3, stride=2, pad=1):
    """x: (C, N, H, W) channel-major -> patches (C*k*k, N*Ho*Wo), Ho, Wo."""
    C, N, H, W = x_cnhw.shape
    Ho = (H - ksize + 2 * pad) // stride + 1
    Wo = (W - ksize + 2 * pad) // stride + 1
    xp = jnp.pad(x_cnhw, ((0, 0), (0, 0), (pad, pad), (pad, pad)))
    cols = []
    for i in range(ksize):
        for j in range(ksize):
            cols.append(xp[:, :, i:i + stride * Ho:stride, j:j + stride * Wo:stride])
    p = jnp.stack(cols, axis=1)                               # (C, 9, N, Ho, Wo)
    return p.reshape(C * ksize * ksize, N * Ho * Wo), Ho, Wo


def conv_bn_relu(x_cnhw, w, gamma, beta, *, m_tile_target=1024):
    """Conv2d(3x3, s=2, p=1) + BN(train) + ReLU, channel-major in and out.

    Two grid-tiled Pallas calls: (1) matmul + stats accumulation, (2) normalize.
    Output dtype bfloat16, channel-major (Cout, N, Ho, Wo).
    """
    Cout = w.shape[0]
    _, N, _, _ = x_cnhw.shape
    patches, Ho, Wo = im2col_cm(x_cnhw)                       # (K, M)
    M = patches.shape[1]
    w2d = w.reshape(Cout, -1)                                 # (Cout, K)

    # Zero-pad K to a multiple of 8 (clean sublane tiles, no extra FLOPs).
    Kp = _round_up(patches.shape[0], 8)
    if Kp != patches.shape[0]:
        patches = jnp.pad(patches, ((0, Kp - patches.shape[0]), (0, 0)))
        w2d = jnp.pad(w2d, ((0, 0), (0, Kp - w2d.shape[1])))

    # M-tiling: lane-dense multiples of 128, <= m_tile_target (VMEM-safe on v7x).
    Mt = m_tile_target if M > m_tile_target else _round_up(M, 128)
    Mp = _round_up(M, Mt)
    if Mp != M:
        # Zero columns contribute 0 to sum/sumsq; divisor uses the true M.
        patches = jnp.pad(patches, ((0, 0), (0, Mp - M)))
    n_m = Mp // Mt

    patches = patches.astype(jnp.bfloat16)
    w_bf = w2d.astype(jnp.bfloat16)
    gamma2 = gamma.reshape(Cout, 1)
    beta2 = beta.reshape(Cout, 1)

    y_pre, sums, sqs = pl.pallas_call(
        conv_stats_kernel,
        grid=(n_m,),
        in_specs=[pl.BlockSpec((Cout, Kp), lambda m: (0, 0)),
                  pl.BlockSpec((Kp, Mt), lambda m: (0, m))],
        out_specs=[pl.BlockSpec((Cout, Mt), lambda m: (0, m)),
                   pl.BlockSpec((Cout, 1), lambda m: (0, 0)),
                   pl.BlockSpec((Cout, 1), lambda m: (0, 0))],
        out_shape=(jax.ShapeDtypeStruct((Cout, Mp), jnp.bfloat16),
                   jax.ShapeDtypeStruct((Cout, 1), jnp.float32),
                   jax.ShapeDtypeStruct((Cout, 1), jnp.float32)),
        compiler_params=pltpu.CompilerParams(
            dimension_semantics=("arbitrary",),
            vmem_limit_bytes=VMEM_LIMIT),
        cost_estimate=pl.CostEstimate(
            flops=2 * Cout * Kp * Mp, transcendentals=0,
            bytes_accessed=2 * Kp * Mp + 2 * Cout * Kp + 2 * Cout * Mp + 8 * Cout),
    )(w_bf, patches)

    out = pl.pallas_call(
        functools.partial(bn_relu_kernel, inv_count=1.0 / M),
        grid=(n_m,),
        in_specs=[pl.BlockSpec((Cout, Mt), lambda m: (0, m)),
                  pl.BlockSpec((Cout, 1), lambda m: (0, 0)),
                  pl.BlockSpec((Cout, 1), lambda m: (0, 0)),
                  pl.BlockSpec((Cout, 1), lambda m: (0, 0)),
                  pl.BlockSpec((Cout, 1), lambda m: (0, 0))],
        out_specs=pl.BlockSpec((Cout, Mt), lambda m: (0, m)),
        out_shape=jax.ShapeDtypeStruct((Cout, Mp), jnp.bfloat16),
        compiler_params=pltpu.CompilerParams(
            dimension_semantics=("parallel",),
            vmem_limit_bytes=VMEM_LIMIT),
        cost_estimate=pl.CostEstimate(
            flops=6 * Cout * Mp, transcendentals=Cout,
            bytes_accessed=4 * Cout * Mp + 24 * Cout),
    )(y_pre, sums, sqs, gamma2, beta2)

    return out[:, :M].reshape(Cout, N, Ho, Wo)                # stays channel-major


def gru_last_hidden(x_tnd, w_ih, w_hh, b_ih, b_hh, hidden):
    """x_tnd: (T, N, D) time-major. Returns final hidden state (N, hidden)."""
    T, N, D = x_tnd.shape
    H = hidden
    Hp = _round_up(H, 128)                                    # lane-aligned gate stride

    def pad_gate_cols(m2d):
        # (..., 3H) -> (..., 3*Hp) with gate g placed at lane offset g*Hp.
        if Hp == H:
            return m2d
        parts = [jnp.pad(m2d[:, g * H:(g + 1) * H], ((0, 0), (0, Hp - H)))
                 for g in range(3)]
        return jnp.concatenate(parts, axis=-1)

    wih_p = pad_gate_cols(w_ih.T)                             # (D, 3*Hp)
    whh_p = pad_gate_cols(w_hh.T)                             # (H, 3*Hp)
    whh_p = jnp.pad(whh_p, ((0, Hp - H), (0, 0)))             # (Hp, 3*Hp), pad rows zero
    bih_p = pad_gate_cols(b_ih.reshape(1, -1))                # (1, 3*Hp)
    bhh_p = pad_gate_cols(b_hh.reshape(1, -1))                # (1, 3*Hp)

    # Hoisted input projection: row-tiled, MXU-friendly matmul over all T*N rows.
    rows = T * N
    bm = min(_round_up(rows, 8), 256)
    rows_pad = _round_up(rows, bm)
    x2d = x_tnd.reshape(rows, D).astype(jnp.bfloat16)
    if rows_pad != rows:
        x2d = jnp.pad(x2d, ((0, rows_pad - rows), (0, 0)))
    n_r = rows_pad // bm

    gx2d = pl.pallas_call(
        matmul_bias_kernel,
        grid=(n_r,),
        in_specs=[pl.BlockSpec((bm, D), lambda r: (r, 0)),
                  pl.BlockSpec((D, 3 * Hp), lambda r: (0, 0)),
                  pl.BlockSpec((1, 3 * Hp), lambda r: (0, 0))],
        out_specs=pl.BlockSpec((bm, 3 * Hp), lambda r: (r, 0)),
        out_shape=jax.ShapeDtypeStruct((rows_pad, 3 * Hp), jnp.float32),
        compiler_params=pltpu.CompilerParams(
            dimension_semantics=("parallel",),
            vmem_limit_bytes=VMEM_LIMIT),
        cost_estimate=pl.CostEstimate(
            flops=2 * rows_pad * D * 3 * Hp, transcendentals=0,
            bytes_accessed=2 * rows_pad * D + 2 * D * 3 * Hp + 4 * rows_pad * 3 * Hp),
    )(x2d, wih_p.astype(jnp.bfloat16), bih_p)
    gx_tnd = gx2d[:rows].reshape(T, N, 3 * Hp)                # time-major view

    # Serial recurrence: single Pallas call, in-kernel unrolled fori_loop over T.
    h_pad = pl.pallas_call(
        gru_rec_kernel,
        out_shape=jax.ShapeDtypeStruct((N, Hp), jnp.float32),
        compiler_params=pltpu.CompilerParams(vmem_limit_bytes=VMEM_LIMIT),
    )(gx_tnd, whh_p, bhh_p)
    return h_pad[:, :H]


# ----------------------------------------------------------------------------
# ReferenceEncoder parameters + forward
# ----------------------------------------------------------------------------
def calculate_channels(L, kernel_size, stride, pad, n_convs):
    for _ in range(n_convs):
        L = (L - kernel_size + 2 * pad) // stride + 1
    return L


def init_params(key, n_mel_channels, ref_enc_filters, gru_size):
    chans = [1] + list(ref_enc_filters)
    K = len(ref_enc_filters)
    keys = jax.random.split(key, K + 4)
    convs = []
    for i in range(K):
        w = 0.1 * jax.random.normal(keys[i], (chans[i + 1], chans[i], 3, 3),
                                    jnp.float32)
        # Conv bias omitted: train-mode BatchNorm's mean subtraction cancels it.
        gamma = jnp.ones((chans[i + 1],), jnp.float32)        # BN weight (torch default)
        beta = jnp.zeros((chans[i + 1],), jnp.float32)        # BN bias (torch default)
        convs.append((w, gamma, beta))
    L = calculate_channels(n_mel_channels, 3, 2, 1, K)
    D = ref_enc_filters[-1] * L
    w_ih = 0.1 * jax.random.normal(keys[K + 0], (3 * gru_size, D), jnp.float32)
    w_hh = 0.1 * jax.random.normal(keys[K + 1], (3 * gru_size, gru_size), jnp.float32)
    b_ih = 0.1 * jax.random.normal(keys[K + 2], (3 * gru_size,), jnp.float32)
    b_hh = 0.1 * jax.random.normal(keys[K + 3], (3 * gru_size,), jnp.float32)
    return {"convs": convs, "gru": (w_ih, w_hh, b_ih, b_hh)}


def reference_encoder_forward(params, inputs, n_mel_channels, gru_size):
    """inputs: (N, Ty, n_mel_channels) -> (N, gru_size)."""
    N = inputs.shape[0]
    # (N, Ty, mels) -> channel-major (C=1, N, Ty, mels): a pure reshape (view).
    out = inputs.reshape(1, N, -1, n_mel_channels)
    for (w, gamma, beta) in params["convs"]:
        out = conv_bn_relu(out, w, gamma, beta)
    # out: (C, N, T, Mf) bf16.  PyTorch flattens features in (C, Mf) order; we
    # also want time-major for the GRU -> single relayout (C,N,T,Mf)->(T,N,C*Mf).
    C, _, T, Mf = out.shape
    x_tnd = out.transpose(2, 1, 0, 3).reshape(T, N, C * Mf)
    w_ih, w_hh, b_ih, b_hh = params["gru"]
    return gru_last_hidden(x_tnd, w_ih, w_hh, b_ih, b_hh, hidden=gru_size)


# ----------------------------------------------------------------------------
if __name__ == "__main__":
    # Hyperparameters (small, synthetic)
    n_mel_channels = 32
    ref_enc_filters = [4, 8, 16]
    ref_enc_gru_size = 32
    N, Ty = 2, 16

    key = jax.random.PRNGKey(0)
    k_params, k_input = jax.random.split(key)
    params = init_params(k_params, n_mel_channels, ref_enc_filters, ref_enc_gru_size)
    inputs = jax.random.normal(k_input, (N, Ty, n_mel_channels), jnp.float32)

    fwd = jax.jit(reference_encoder_forward, static_argnums=(2, 3))
    out = fwd(params, inputs, n_mel_channels, ref_enc_gru_size)
    out = jax.block_until_ready(out)
    assert out.shape == (N, ref_enc_gru_size), out.shape
    assert jnp.all(jnp.isfinite(out))
    print("KERNEL_OK")
</pallas_src>

<mosaic_0001>
module attributes {stable_mosaic.version = 11 : i64} {
  func.func @conv_stats_kernel(%arg0: i32, %arg1: memref<4x16xbf16, #tpu.memory_space<vmem>>, %arg2: memref<16x256xbf16, #tpu.memory_space<vmem>>, %arg3: memref<4x256xbf16, #tpu.memory_space<vmem>>, %arg4: memref<4x1xf32, #tpu.memory_space<vmem>>, %arg5: memref<4x1xf32, #tpu.memory_space<vmem>>) attributes {dimension_semantics = [#tpu.dimension_semantics<arbitrary>], iteration_bounds = array<i64: 1>, scalar_prefetch = 0 : i64, scratch_operands = 0 : i64, tpu.core_type = #tpu.core_type<tc>, window_params = [{pipeline_mode = #tpu.pipeline_mode<synchronous>, transform_indices = @transform_0, window_bounds = array<i64: 4, 16>}, {transform_indices = @transform_1, window_bounds = array<i64: 16, 256>}, {transform_indices = @transform_2, window_bounds = array<i64: 4, 256>}, {pipeline_mode = #tpu.pipeline_mode<synchronous>, transform_indices = @transform_3, window_bounds = array<i64: 4, 1>}, {pipeline_mode = #tpu.pipeline_mode<synchronous>, transform_indices = @transform_4, window_bounds = array<i64: 4, 1>}]} {
    %c0_i32 = arith.constant 0 : i32
    %0 = arith.cmpi eq, %arg0, %c0_i32 : i32
    %1 = arith.extui %0 : i1 to i32
    %c0_i32_0 = arith.constant 0 : i32
    %2 = arith.cmpi ne, %1, %c0_i32_0 : i32
    scf.if %2 {
      %cst_16 = arith.constant 0.000000e+00 : f32
      %19 = vector.broadcast %cst_16 : f32 to vector<4x1xf32>
      %c0_17 = arith.constant 0 : index
      %c0_18 = arith.constant 0 : index
      %20 = vector.load %arg4[%c0_17, %c0_18] : memref<4x1xf32, #tpu.memory_space<vmem>>, vector<4x1xf32>
      tpu.vector_store %arg4[%c0_17, %c0_18], %19 {strides = array<i32>} : memref<4x1xf32, #tpu.memory_space<vmem>>, vector<4x1xf32>,
      %cst_19 = arith.constant 0.000000e+00 : f32
      %21 = vector.broadcast %cst_19 : f32 to vector<4x1xf32>
      %c0_20 = arith.constant 0 : index
      %c0_21 = arith.constant 0 : index
      %22 = vector.load %arg5[%c0_20, %c0_21] : memref<4x1xf32, #tpu.memory_space<vmem>>, vector<4x1xf32>
      tpu.vector_store %arg5[%c0_20, %c0_21], %21 {strides = array<i32>} : memref<4x1xf32, #tpu.memory_space<vmem>>, vector<4x1xf32>,
    } else {
    }
    %c0 = arith.constant 0 : index
    %c0_1 = arith.constant 0 : index
    %3 = vector.load %arg1[%c0, %c0_1] : memref<4x16xbf16, #tpu.memory_space<vmem>>, vector<4x16xbf16>
    %c0_2 = arith.constant 0 : index
    %c0_3 = arith.constant 0 : index
    %4 = vector.load %arg2[%c0_2, %c0_3] : memref<16x256xbf16, #tpu.memory_space<vmem>>, vector<16x256xbf16>
    %cst = arith.constant dense<0.000000e+00> : vector<4x256xf32>
    %5 = tpu.matmul %3, %4, %cst {dimension_numbers = #tpu.dot_dimension_numbers<[1], [0], [0], [1], [0, 0, 1, 1], [], []>} : vector<4x16xbf16>, vector<16x256xbf16>, vector<4x256xf32> -> vector<4x256xf32>
    %c0_4 = arith.constant 0 : index
    %c0_5 = arith.constant 0 : index
    %6 = vector.load %arg4[%c0_4, %c0_5] : memref<4x1xf32, #tpu.memory_space<vmem>>, vector<4x1xf32>
    %cst_6 = arith.constant dense<0.000000e+00> : vector<4xf32>
    %7 = vector.multi_reduction <add>, %5, %cst_6 [1] : vector<4x256xf32> to vector<4xf32>
    %8 = vector.shape_cast %7 : vector<4xf32> to vector<4x1xf32>
    %9 = arith.addf %6, %8 : vector<4x1xf32>
    %c0_7 = arith.constant 0 : index
    %c0_8 = arith.constant 0 : index
    %10 = vector.load %arg4[%c0_7, %c0_8] : memref<4x1xf32, #tpu.memory_space<vmem>>, vector<4x1xf32>
    tpu.vector_store %arg4[%c0_7, %c0_8], %9 {strides = array<i32>} : memref<4x1xf32, #tpu.memory_space<vmem>>, vector<4x1xf32>,
    %c0_9 = arith.constant 0 : index
    %c0_10 = arith.constant 0 : index
    %11 = vector.load %arg5[%c0_9, %c0_10] : memref<4x1xf32, #tpu.memory_space<vmem>>, vector<4x1xf32>
    %12 = arith.mulf %5, %5 : vector<4x256xf32>
    %cst_11 = arith.constant dense<0.000000e+00> : vector<4xf32>
    %13 = vector.multi_reduction <add>, %12, %cst_11 [1] : vector<4x256xf32> to vector<4xf32>
    %14 = vector.shape_cast %13 : vector<4xf32> to vector<4x1xf32>
    %15 = arith.addf %11, %14 : vector<4x1xf32>
    %c0_12 = arith.constant 0 : index
    %c0_13 = arith.constant 0 : index
    %16 = vector.load %arg5[%c0_12, %c0_13] : memref<4x1xf32, #tpu.memory_space<vmem>>, vector<4x1xf32>
    tpu.vector_store %arg5[%c0_12, %c0_13], %15 {strides = array<i32>} : memref<4x1xf32, #tpu.memory_space<vmem>>, vector<4x1xf32>,
    %17 = arith.truncf %5 : vector<4x256xf32> to vector<4x256xbf16>
    %c0_14 = arith.constant 0 : index
    %c0_15 = arith.constant 0 : index
    %18 = vector.load %arg3[%c0_14, %c0_15] : memref<4x256xbf16, #tpu.memory_space<vmem>>, vector<4x256xbf16>
    tpu.vector_store %arg3[%c0_14, %c0_15], %17 {strides = array<i32>} : memref<4x256xbf16, #tpu.memory_space<vmem>>, vector<4x256xbf16>,
    return
  }
  func.func @transform_0(%arg0: i32) -> (i32, i32) {
    %c0_i32 = arith.constant 0 : i32
    %c0_i32_0 = arith.constant 0 : i32
    %c0_i32_1 = arith.constant 0 : i32
    return %c0_i32, %c0_i32_0 : i32, i32
  }
  func.func @transform_1(%arg0: i32) -> (i32, i32) {
    %c0_i32 = arith.constant 0 : i32
    %c0_i32_0 = arith.constant 0 : i32
    return %c0_i32, %arg0 : i32, i32
  }
  func.func @transform_2(%arg0: i32) -> (i32, i32) {
    %c0_i32 = arith.constant 0 : i32
    %c0_i32_0 = arith.constant 0 : i32
    return %c0_i32, %arg0 : i32, i32
  }
  func.func @transform_3(%arg0: i32) -> (i32, i32) {
    %c0_i32 = arith.constant 0 : i32
    %c0_i32_0 = arith.constant 0 : i32
    %c0_i32_1 = arith.constant 0 : i32
    return %c0_i32, %c0_i32_0 : i32, i32
  }
  func.func @transform_4(%arg0: i32) -> (i32, i32) {
    %c0_i32 = arith.constant 0 : i32
    %c0_i32_0 = arith.constant 0 : i32
    %c0_i32_1 = arith.constant 0 : i32
    return %c0_i32, %c0_i32_0 : i32, i32
  }
}

module attributes {stable_mosaic.version = 11 : i64} {
  func.func @bn_relu_kernel(%arg0: i32, %arg1: memref<4x256xbf16, #tpu.memory_space<vmem>>, %arg2: memref<4x1xf32, #tpu.memory_space<vmem>>, %arg3: memref<4x1xf32, #tpu.memory_space<vmem>>, %arg4: memref<4x1xf32, #tpu.memory_space<vmem>>, %arg5: memref<4x1xf32, #tpu.memory_space<vmem>>, %arg6: memref<4x256xbf16, #tpu.memory_space<vmem>>) attributes {dimension_semantics = [#tpu.dimension_semantics<parallel>], iteration_bounds = array<i64: 1>, scalar_prefetch = 0 : i64, scratch_operands = 0 : i64, tpu.core_type = #tpu.core_type<tc>, window_params = [{transform_indices = @transform_0, window_bounds = array<i64: 4, 256>}, {pipeline_mode = #tpu.pipeline_mode<synchronous>, transform_indices = @transform_1, window_bounds = array<i64: 4, 1>}, {pipeline_mode = #tpu.pipeline_mode<synchronous>, transform_indices = @transform_2, window_bounds = array<i64: 4, 1>}, {pipeline_mode = #tpu.pipeline_mode<synchronous>, transform_indices = @transform_3, window_bounds = array<i64: 4, 1>}, {pipeline_mode = #tpu.pipeline_mode<synchronous>, transform_indices = @transform_4, window_bounds = array<i64: 4, 1>}, {transform_indices = @transform_5, window_bounds = array<i64: 4, 256>}]} {
    %c0 = arith.constant 0 : index
    %c0_0 = arith.constant 0 : index
    %0 = vector.load %arg1[%c0, %c0_0] : memref<4x256xbf16, #tpu.memory_space<vmem>>, vector<4x256xbf16>
    %1 = arith.extf %0 : vector<4x256xbf16> to vector<4x256xf32>
    %c0_1 = arith.constant 0 : index
    %c0_2 = arith.constant 0 : index
    %2 = vector.load %arg2[%c0_1, %c0_2] : memref<4x1xf32, #tpu.memory_space<vmem>>, vector<4x1xf32>
    %cst = arith.constant 3.906250e-03 : f32
    %3 = vector.broadcast %cst : f32 to vector<4x1xf32>
    %4 = arith.mulf %2, %3 : vector<4x1xf32>
    %c0_3 = arith.constant 0 : index
    %c0_4 = arith.constant 0 : index
    %5 = vector.load %arg3[%c0_3, %c0_4] : memref<4x1xf32, #tpu.memory_space<vmem>>, vector<4x1xf32>
    %cst_5 = arith.constant 3.906250e-03 : f32
    %6 = vector.broadcast %cst_5 : f32 to vector<4x1xf32>
    %7 = arith.mulf %5, %6 : vector<4x1xf32>
    %8 = arith.mulf %4, %4 : vector<4x1xf32>
    %9 = arith.subf %7, %8 : vector<4x1xf32>
    %cst_6 = arith.constant 0.000000e+00 : f32
    %10 = vector.broadcast %cst_6 : f32 to vector<4x1xf32>
    %11 = arith.maximumf %9, %10 : vector<4x1xf32>
    %c0_7 = arith.constant 0 : index
    %c0_8 = arith.constant 0 : index
    %12 = vector.load %arg4[%c0_7, %c0_8] : memref<4x1xf32, #tpu.memory_space<vmem>>, vector<4x1xf32>
    %cst_9 = arith.constant 9.99999974E-6 : f32
    %13 = vector.broadcast %cst_9 : f32 to vector<4x1xf32>
    %14 = arith.addf %11, %13 : vector<4x1xf32>
    %15 = math.rsqrt %14 : vector<4x1xf32>
    %16 = arith.mulf %12, %15 : vector<4x1xf32>
    %17 = vector.broadcast %4 : vector<4x1xf32> to vector<4x256xf32>
    %18 = arith.subf %1, %17 : vector<4x256xf32>
    %19 = vector.broadcast %16 : vector<4x1xf32> to vector<4x256xf32>
    %20 = arith.mulf %18, %19 : vector<4x256xf32>
    %c0_10 = arith.constant 0 : index
    %c0_11 = arith.constant 0 : index
    %21 = vector.load %arg5[%c0_10, %c0_11] : memref<4x1xf32, #tpu.memory_space<vmem>>, vector<4x1xf32>
    %22 = vector.broadcast %21 : vector<4x1xf32> to vector<4x256xf32>
    %23 = arith.addf %20, %22 : vector<4x256xf32>
    %cst_12 = arith.constant 0.000000e+00 : f32
    %24 = vector.broadcast %cst_12 : f32 to vector<4x256xf32>
    %25 = arith.maximumf %23, %24 : vector<4x256xf32>
    %26 = arith.truncf %25 : vector<4x256xf32> to vector<4x256xbf16>
    %c0_13 = arith.constant 0 : index
    %c0_14 = arith.constant 0 : index
    %27 = vector.load %arg6[%c0_13, %c0_14] : memref<4x256xbf16, #tpu.memory_space<vmem>>, vector<4x256xbf16>
    tpu.vector_store %arg6[%c0_13, %c0_14], %26 {strides = array<i32>} : memref<4x256xbf16, #tpu.memory_space<vmem>>, vector<4x256xbf16>,
    return
  }
  func.func @transform_0(%arg0: i32) -> (i32, i32) {
    %c0_i32 = arith.constant 0 : i32
    %c0_i32_0 = arith.constant 0 : i32
    return %c0_i32, %arg0 : i32, i32
  }
  func.func @transform_1(%arg0: i32) -> (i32, i32) {
    %c0_i32 = arith.constant 0 : i32
    %c0_i32_0 = arith.constant 0 : i32
    %c0_i32_1 = arith.constant 0 : i32
    return %c0_i32, %c0_i32_0 : i32, i32
  }
  func.func @transform_2(%arg0: i32) -> (i32, i32) {
    %c0_i32 = arith.constant 0 : i32
    %c0_i32_0 = arith.constant 0 : i32
    %c0_i32_1 = arith.constant 0 : i32
    return %c0_i32, %c0_i32_0 : i32, i32
  }
  func.func @transform_3(%arg0: i32) -> (i32, i32) {
    %c0_i32 = arith.constant 0 : i32
    %c0_i32_0 = arith.constant 0 : i32
    %c0_i32_1 = arith.constant 0 : i32
    return %c0_i32, %c0_i32_0 : i32, i32
  }
  func.func @transform_4(%arg0: i32) -> (i32, i32) {
    %c0_i32 = arith.constant 0 : i32
    %c0_i32_0 = arith.constant 0 : i32
    %c0_i32_1 = arith.constant 0 : i32
    return %c0_i32, %c0_i32_0 : i32, i32
  }
  func.func @transform_5(%arg0: i32) -> (i32, i32) {
    %c0_i32 = arith.constant 0 : i32
    %c0_i32_0 = arith.constant 0 : i32
    return %c0_i32, %arg0 : i32, i32
  }
}

module attributes {stable_mosaic.version = 11 : i64} {
  func.func @conv_stats_kernel(%arg0: i32, %arg1: memref<8x40xbf16, #tpu.memory_space<vmem>>, %arg2: memref<40x128xbf16, #tpu.memory_space<vmem>>, %arg3: memref<8x128xbf16, #tpu.memory_space<vmem>>, %arg4: memref<8x1xf32, #tpu.memory_space<vmem>>, %arg5: memref<8x1xf32, #tpu.memory_space<vmem>>) attributes {dimension_semantics = [#tpu.dimension_semantics<arbitrary>], iteration_bounds = array<i64: 1>, scalar_prefetch = 0 : i64, scratch_operands = 0 : i64, tpu.core_type = #tpu.core_type<tc>, window_params = [{pipeline_mode = #tpu.pipeline_mode<synchronous>, transform_indices = @transform_0, window_bounds = array<i64: 8, 40>}, {transform_indices = @transform_1, window_bounds = array<i64: 40, 128>}, {transform_indices = @transform_2, window_bounds = array<i64: 8, 128>}, {pipeline_mode = #tpu.pipeline_mode<synchronous>, transform_indices = @transform_3, window_bounds = array<i64: 8, 1>}, {pipeline_mode = #tpu.pipeline_mode<synchronous>, transform_indices = @transform_4, window_bounds = array<i64: 8, 1>}]} {
    %c0_i32 = arith.constant 0 : i32
    %0 = arith.cmpi eq, %arg0, %c0_i32 : i32
    %1 = arith.extui %0 : i1 to i32
    %c0_i32_0 = arith.constant 0 : i32
    %2 = arith.cmpi ne, %1, %c0_i32_0 : i32
    scf.if %2 {
      %cst_16 = arith.constant 0.000000e+00 : f32
      %19 = vector.broadcast %cst_16 : f32 to vector<8x1xf32>
      %c0_17 = arith.constant 0 : index
      %c0_18 = arith.constant 0 : index
      %20 = vector.load %arg4[%c0_17, %c0_18] : memref<8x1xf32, #tpu.memory_space<vmem>>, vector<8x1xf32>
      tpu.vector_store %arg4[%c0_17, %c0_18], %19 {strides = array<i32>} : memref<8x1xf32, #tpu.memory_space<vmem>>, vector<8x1xf32>,
      %cst_19 = arith.constant 0.000000e+00 : f32
      %21 = vector.broadcast %cst_19 : f32 to vector<8x1xf32>
      %c0_20 = arith.constant 0 : index
      %c0_21 = arith.constant 0 : index
      %22 = vector.load %arg5[%c0_20, %c0_21] : memref<8x1xf32, #tpu.memory_space<vmem>>, vector<8x1xf32>
      tpu.vector_store %arg5[%c0_20, %c0_21], %21 {strides = array<i32>} : memref<8x1xf32, #tpu.memory_space<vmem>>, vector<8x1xf32>,
    } else {
    }
    %c0 = arith.constant 0 : index
    %c0_1 = arith.constant 0 : index
    %3 = vector.load %arg1[%c0, %c0_1] : memref<8x40xbf16, #tpu.memory_space<vmem>>, vector<8x40xbf16>
    %c0_2 = arith.constant 0 : index
    %c0_3 = arith.constant 0 : index
    %4 = vector.load %arg2[%c0_2, %c0_3] : memref<40x128xbf16, #tpu.memory_space<vmem>>, vector<40x128xbf16>
    %cst = arith.constant dense<0.000000e+00> : vector<8x128xf32>
    %5 = tpu.matmul %3, %4, %cst {dimension_numbers = #tpu.dot_dimension_numbers<[1], [0], [0], [1], [0, 0, 1, 1], [], []>} : vector<8x40xbf16>, vector<40x128xbf16>, vector<8x128xf32> -> vector<8x128xf32>
    %c0_4 = arith.constant 0 : index
    %c0_5 = arith.constant 0 : index
    %6 = vector.load %arg4[%c0_4, %c0_5] : memref<8x1xf32, #tpu.memory_space<vmem>>, vector<8x1xf32>
    %cst_6 = arith.constant dense<0.000000e+00> : vector<8xf32>
    %7 = vector.multi_reduction <add>, %5, %cst_6 [1] : vector<8x128xf32> to vector<8xf32>
    %8 = vector.shape_cast %7 : vector<8xf32> to vector<8x1xf32>
    %9 = arith.addf %6, %8 : vector<8x1xf32>
    %c0_7 = arith.constant 0 : index
    %c0_8 = arith.constant 0 : index
    %10 = vector.load %arg4[%c0_7, %c0_8] : memref<8x1xf32, #tpu.memory_space<vmem>>, vector<8x1xf32>
    tpu.vector_store %arg4[%c0_7, %c0_8], %9 {strides = array<i32>} : memref<8x1xf32, #tpu.memory_space<vmem>>, vector<8x1xf32>,
    %c0_9 = arith.constant 0 : index
    %c0_10 = arith.constant 0 : index
    %11 = vector.load %arg5[%c0_9, %c0_10] : memref<8x1xf32, #tpu.memory_space<vmem>>, vector<8x1xf32>
    %12 = arith.mulf %5, %5 : vector<8x128xf32>
    %cst_11 = arith.constant dense<0.000000e+00> : vector<8xf32>
    %13 = vector.multi_reduction <add>, %12, %cst_11 [1] : vector<8x128xf32> to vector<8xf32>
    %14 = vector.shape_cast %13 : vector<8xf32> to vector<8x1xf32>
    %15 = arith.addf %11, %14 : vector<8x1xf32>
    %c0_12 = arith.constant 0 : index
    %c0_13 = arith.constant 0 : index
    %16 = vector.load %arg5[%c0_12, %c0_13] : memref<8x1xf32, #tpu.memory_space<vmem>>, vector<8x1xf32>
    tpu.vector_store %arg5[%c0_12, %c0_13], %15 {strides = array<i32>} : memref<8x1xf32, #tpu.memory_space<vmem>>, vector<8x1xf32>,
    %17 = arith.truncf %5 : vector<8x128xf32> to vector<8x128xbf16>
    %c0_14 = arith.constant 0 : index
    %c0_15 = arith.constant 0 : index
    %18 = vector.load %arg3[%c0_14, %c0_15] : memref<8x128xbf16, #tpu.memory_space<vmem>>, vector<8x128xbf16>
    tpu.vector_store %arg3[%c0_14, %c0_15], %17 {strides = array<i32>} : memref<8x128xbf16, #tpu.memory_space<vmem>>, vector<8x128xbf16>,
    return
  }
  func.func @transform_0(%arg0: i32) -> (i32, i32) {
    %c0_i32 = arith.constant 0 : i32
    %c0_i32_0 = arith.constant 0 : i32
    %c0_i32_1 = arith.constant 0 : i32
    return %c0_i32, %c0_i32_0 : i32, i32
  }
  func.func @transform_1(%arg0: i32) -> (i32, i32) {
    %c0_i32 = arith.constant 0 : i32
    %c0_i32_0 = arith.constant 0 : i32
    return %c0_i32, %arg0 : i32, i32
  }
  func.func @transform_2(%arg0: i32) -> (i32, i32) {
    %c0_i32 = arith.constant 0 : i32
    %c0_i32_0 = arith.constant 0 : i32
    return %c0_i32, %arg0 : i32, i32
  }
  func.func @transform_3(%arg0: i32) -> (i32, i32) {
    %c0_i32 = arith.constant 0 : i32
    %c0_i32_0 = arith.constant 0 : i32
    %c0_i32_1 = arith.constant 0 : i32
    return %c0_i32, %c0_i32_0 : i32, i32
  }
  func.func @transform_4(%arg0: i32) -> (i32, i32) {
    %c0_i32 = arith.constant 0 : i32
    %c0_i32_0 = arith.constant 0 : i32
    %c0_i32_1 = arith.constant 0 : i32
    return %c0_i32, %c0_i32_0 : i32, i32
  }
}

module attributes {stable_mosaic.version = 11 : i64} {
  func.func @bn_relu_kernel(%arg0: i32, %arg1: memref<8x128xbf16, #tpu.memory_space<vmem>>, %arg2: memref<8x1xf32, #tpu.memory_space<vmem>>, %arg3: memref<8x1xf32, #tpu.memory_space<vmem>>, %arg4: memref<8x1xf32, #tpu.memory_space<vmem>>, %arg5: memref<8x1xf32, #tpu.memory_space<vmem>>, %arg6: memref<8x128xbf16, #tpu.memory_space<vmem>>) attributes {dimension_semantics = [#tpu.dimension_semantics<parallel>], iteration_bounds = array<i64: 1>, scalar_prefetch = 0 : i64, scratch_operands = 0 : i64, tpu.core_type = #tpu.core_type<tc>, window_params = [{transform_indices = @transform_0, window_bounds = array<i64: 8, 128>}, {pipeline_mode = #tpu.pipeline_mode<synchronous>, transform_indices = @transform_1, window_bounds = array<i64: 8, 1>}, {pipeline_mode = #tpu.pipeline_mode<synchronous>, transform_indices = @transform_2, window_bounds = array<i64: 8, 1>}, {pipeline_mode = #tpu.pipeline_mode<synchronous>, transform_indices = @transform_3, window_bounds = array<i64: 8, 1>}, {pipeline_mode = #tpu.pipeline_mode<synchronous>, transform_indices = @transform_4, window_bounds = array<i64: 8, 1>}, {transform_indices = @transform_5, window_bounds = array<i64: 8, 128>}]} {
    %c0 = arith.constant 0 : index
    %c0_0 = arith.constant 0 : index
    %0 = vector.load %arg1[%c0, %c0_0] : memref<8x128xbf16, #tpu.memory_space<vmem>>, vector<8x128xbf16>
    %1 = arith.extf %0 : vector<8x128xbf16> to vector<8x128xf32>
    %c0_1 = arith.constant 0 : index
    %c0_2 = arith.constant 0 : index
    %2 = vector.load %arg2[%c0_1, %c0_2] : memref<8x1xf32, #tpu.memory_space<vmem>>, vector<8x1xf32>
    %cst = arith.constant 1.562500e-02 : f32
    %3 = vector.broadcast %cst : f32 to vector<8x1xf32>
    %4 = arith.mulf %2, %3 : vector<8x1xf32>
    %c0_3 = arith.constant 0 : index
    %c0_4 = arith.constant 0 : index
    %5 = vector.load %arg3[%c0_3, %c0_4] : memref<8x1xf32, #tpu.memory_space<vmem>>, vector<8x1xf32>
    %cst_5 = arith.constant 1.562500e-02 : f32
    %6 = vector.broadcast %cst_5 : f32 to vector<8x1xf32>
    %7 = arith.mulf %5, %6 : vector<8x1xf32>
    %8 = arith.mulf %4, %4 : vector<8x1xf32>
    %9 = arith.subf %7, %8 : vector<8x1xf32>
    %cst_6 = arith.constant 0.000000e+00 : f32
    %10 = vector.broadcast %cst_6 : f32 to vector<8x1xf32>
    %11 = arith.maximumf %9, %10 : vector<8x1xf32>
    %c0_7 = arith.constant 0 : index
    %c0_8 = arith.constant 0 : index
    %12 = vector.load %arg4[%c0_7, %c0_8] : memref<8x1xf32, #tpu.memory_space<vmem>>, vector<8x1xf32>
    %cst_9 = arith.constant 9.99999974E-6 : f32
    %13 = vector.broadcast %cst_9 : f32 to vector<8x1xf32>
    %14 = arith.addf %11, %13 : vector<8x1xf32>
    %15 = math.rsqrt %14 : vector<8x1xf32>
    %16 = arith.mulf %12, %15 : vector<8x1xf32>
    %17 = vector.broadcast %4 : vector<8x1xf32> to vector<8x128xf32>
    %18 = arith.subf %1, %17 : vector<8x128xf32>
    %19 = vector.broadcast %16 : vector<8x1xf32> to vector<8x128xf32>
    %20 = arith.mulf %18, %19 : vector<8x128xf32>
    %c0_10 = arith.constant 0 : index
    %c0_11 = arith.constant 0 : index
    %21 = vector.load %arg5[%c0_10, %c0_11] : memref<8x1xf32, #tpu.memory_space<vmem>>, vector<8x1xf32>
    %22 = vector.broadcast %21 : vector<8x1xf32> to vector<8x128xf32>
    %23 = arith.addf %20, %22 : vector<8x128xf32>
    %cst_12 = arith.constant 0.000000e+00 : f32
    %24 = vector.broadcast %cst_12 : f32 to vector<8x128xf32>
    %25 = arith.maximumf %23, %24 : vector<8x128xf32>
    %26 = arith.truncf %25 : vector<8x128xf32> to vector<8x128xbf16>
    %c0_13 = arith.constant 0 : index
    %c0_14 = arith.constant 0 : index
    %27 = vector.load %arg6[%c0_13, %c0_14] : memref<8x128xbf16, #tpu.memory_space<vmem>>, vector<8x128xbf16>
    tpu.vector_store %arg6[%c0_13, %c0_14], %26 {strides = array<i32>} : memref<8x128xbf16, #tpu.memory_space<vmem>>, vector<8x128xbf16>,
    return
  }
  func.func @transform_0(%arg0: i32) -> (i32, i32) {
    %c0_i32 = arith.constant 0 : i32
    %c0_i32_0 = arith.constant 0 : i32
    return %c0_i32, %arg0 : i32, i32
  }
  func.func @transform_1(%arg0: i32) -> (i32, i32) {
    %c0_i32 = arith.constant 0 : i32
    %c0_i32_0 = arith.constant 0 : i32
    %c0_i32_1 = arith.constant 0 : i32
    return %c0_i32, %c0_i32_0 : i32, i32
  }
  func.func @transform_2(%arg0: i32) -> (i32, i32) {
    %c0_i32 = arith.constant 0 : i32
    %c0_i32_0 = arith.constant 0 : i32
    %c0_i32_1 = arith.constant 0 : i32
    return %c0_i32, %c0_i32_0 : i32, i32
  }
  func.func @transform_3(%arg0: i32) -> (i32, i32) {
    %c0_i32 = arith.constant 0 : i32
    %c0_i32_0 = arith.constant 0 : i32
    %c0_i32_1 = arith.constant 0 : i32
    return %c0_i32, %c0_i32_0 : i32, i32
  }
  func.func @transform_4(%arg0: i32) -> (i32, i32) {
    %c0_i32 = arith.constant 0 : i32
    %c0_i32_0 = arith.constant 0 : i32
    %c0_i32_1 = arith.constant 0 : i32
    return %c0_i32, %c0_i32_0 : i32, i32
  }
  func.func @transform_5(%arg0: i32) -> (i32, i32) {
    %c0_i32 = arith.constant 0 : i32
    %c0_i32_0 = arith.constant 0 : i32
    return %c0_i32, %arg0 : i32, i32
  }
}

module attributes {stable_mosaic.version = 11 : i64} {
  func.func @conv_stats_kernel(%arg0: i32, %arg1: memref<16x72xbf16, #tpu.memory_space<vmem>>, %arg2: memref<72x128xbf16, #tpu.memory_space<vmem>>, %arg3: memref<16x128xbf16, #tpu.memory_space<vmem>>, %arg4: memref<16x1xf32, #tpu.memory_space<vmem>>, %arg5: memref<16x1xf32, #tpu.memory_space<vmem>>) attributes {dimension_semantics = [#tpu.dimension_semantics<arbitrary>], iteration_bounds = array<i64: 1>, scalar_prefetch = 0 : i64, scratch_operands = 0 : i64, tpu.core_type = #tpu.core_type<tc>, window_params = [{pipeline_mode = #tpu.pipeline_mode<synchronous>, transform_indices = @transform_0, window_bounds = array<i64: 16, 72>}, {transform_indices = @transform_1, window_bounds = array<i64: 72, 128>}, {transform_indices = @transform_2, window_bounds = array<i64: 16, 128>}, {pipeline_mode = #tpu.pipeline_mode<synchronous>, transform_indices = @transform_3, window_bounds = array<i64: 16, 1>}, {pipeline_mode = #tpu.pipeline_mode<synchronous>, transform_indices = @transform_4, window_bounds = array<i64: 16, 1>}]} {
    %c0_i32 = arith.constant 0 : i32
    %0 = arith.cmpi eq, %arg0, %c0_i32 : i32
    %1 = arith.extui %0 : i1 to i32
    %c0_i32_0 = arith.constant 0 : i32
    %2 = arith.cmpi ne, %1, %c0_i32_0 : i32
    scf.if %2 {
      %cst_16 = arith.constant 0.000000e+00 : f32
      %19 = vector.broadcast %cst_16 : f32 to vector<16x1xf32>
      %c0_17 = arith.constant 0 : index
      %c0_18 = arith.constant 0 : index
      %20 = vector.load %arg4[%c0_17, %c0_18] : memref<16x1xf32, #tpu.memory_space<vmem>>, vector<16x1xf32>
      tpu.vector_store %arg4[%c0_17, %c0_18], %19 {strides = array<i32>} : memref<16x1xf32, #tpu.memory_space<vmem>>, vector<16x1xf32>,
      %cst_19 = arith.constant 0.000000e+00 : f32
      %21 = vector.broadcast %cst_19 : f32 to vector<16x1xf32>
      %c0_20 = arith.constant 0 : index
      %c0_21 = arith.constant 0 : index
      %22 = vector.load %arg5[%c0_20, %c0_21] : memref<16x1xf32, #tpu.memory_space<vmem>>, vector<16x1xf32>
      tpu.vector_store %arg5[%c0_20, %c0_21], %21 {strides = array<i32>} : memref<16x1xf32, #tpu.memory_space<vmem>>, vector<16x1xf32>,
    } else {
    }
    %c0 = arith.constant 0 : index
    %c0_1 = arith.constant 0 : index
    %3 = vector.load %arg1[%c0, %c0_1] : memref<16x72xbf16, #tpu.memory_space<vmem>>, vector<16x72xbf16>
    %c0_2 = arith.constant 0 : index
    %c0_3 = arith.constant 0 : index
    %4 = vector.load %arg2[%c0_2, %c0_3] : memref<72x128xbf16, #tpu.memory_space<vmem>>, vector<72x128xbf16>
    %cst = arith.constant dense<0.000000e+00> : vector<16x128xf32>
    %5 = tpu.matmul %3, %4, %cst {dimension_numbers = #tpu.dot_dimension_numbers<[1], [0], [0], [1], [0, 0, 1, 1], [], []>} : vector<16x72xbf16>, vector<72x128xbf16>, vector<16x128xf32> -> vector<16x128xf32>
    %c0_4 = arith.constant 0 : index
    %c0_5 = arith.constant 0 : index
    %6 = vector.load %arg4[%c0_4, %c0_5] : memref<16x1xf32, #tpu.memory_space<vmem>>, vector<16x1xf32>
    %cst_6 = arith.constant dense<0.000000e+00> : vector<16xf32>
    %7 = vector.multi_reduction <add>, %5, %cst_6 [1] : vector<16x128xf32> to vector<16xf32>
    %8 = vector.shape_cast %7 : vector<16xf32> to vector<16x1xf32>
    %9 = arith.addf %6, %8 : vector<16x1xf32>
    %c0_7 = arith.constant 0 : index
    %c0_8 = arith.constant 0 : index
    %10 = vector.load %arg4[%c0_7, %c0_8] : memref<16x1xf32, #tpu.memory_space<vmem>>, vector<16x1xf32>
    tpu.vector_store %arg4[%c0_7, %c0_8], %9 {strides = array<i32>} : memref<16x1xf32, #tpu.memory_space<vmem>>, vector<16x1xf32>,
    %c0_9 = arith.constant 0 : index
    %c0_10 = arith.constant 0 : index
    %11 = vector.load %arg5[%c0_9, %c0_10] : memref<16x1xf32, #tpu.memory_space<vmem>>, vector<16x1xf32>
    %12 = arith.mulf %5, %5 : vector<16x128xf32>
    %cst_11 = arith.constant dense<0.000000e+00> : vector<16xf32>
    %13 = vector.multi_reduction <add>, %12, %cst_11 [1] : vector<16x128xf32> to vector<16xf32>
    %14 = vector.shape_cast %13 : vector<16xf32> to vector<16x1xf32>
    %15 = arith.addf %11, %14 : vector<16x1xf32>
    %c0_12 = arith.constant 0 : index
    %c0_13 = arith.constant 0 : index
    %16 = vector.load %arg5[%c0_12, %c0_13] : memref<16x1xf32, #tpu.memory_space<vmem>>, vector<16x1xf32>
    tpu.vector_store %arg5[%c0_12, %c0_13], %15 {strides = array<i32>} : memref<16x1xf32, #tpu.memory_space<vmem>>, vector<16x1xf32>,
    %17 = arith.truncf %5 : vector<16x128xf32> to vector<16x128xbf16>
    %c0_14 = arith.constant 0 : index
    %c0_15 = arith.constant 0 : index
    %18 = vector.load %arg3[%c0_14, %c0_15] : memref<16x128xbf16, #tpu.memory_space<vmem>>, vector<16x128xbf16>
    tpu.vector_store %arg3[%c0_14, %c0_15], %17 {strides = array<i32>} : memref<16x128xbf16, #tpu.memory_space<vmem>>, vector<16x128xbf16>,
    return
  }
  func.func @transform_0(%arg0: i32) -> (i32, i32) {
    %c0_i32 = arith.constant 0 : i32
    %c0_i32_0 = arith.constant 0 : i32
    %c0_i32_1 = arith.constant 0 : i32
    return %c0_i32, %c0_i32_0 : i32, i32
  }
  func.func @transform_1(%arg0: i32) -> (i32, i32) {
    %c0_i32 = arith.constant 0 : i32
    %c0_i32_0 = arith.constant 0 : i32
    return %c0_i32, %arg0 : i32, i32
  }
  func.func @transform_2(%arg0: i32) -> (i32, i32) {
    %c0_i32 = arith.constant 0 : i32
    %c0_i32_0 = arith.constant 0 : i32
    return %c0_i32, %arg0 : i32, i32
  }
  func.func @transform_3(%arg0: i32) -> (i32, i32) {
    %c0_i32 = arith.constant 0 : i32
    %c0_i32_0 = arith.constant 0 : i32
    %c0_i32_1 = arith.constant 0 : i32
    return %c0_i32, %c0_i32_0 : i32, i32
  }
  func.func @transform_4(%arg0: i32) -> (i32, i32) {
    %c0_i32 = arith.constant 0 : i32
    %c0_i32_0 = arith.constant 0 : i32
    %c0_i32_1 = arith.constant 0 : i32
    return %c0_i32, %c0_i32_0 : i32, i32
  }
}

module attributes {stable_mosaic.version = 11 : i64} {
  func.func @bn_relu_kernel(%arg0: i32, %arg1: memref<16x128xbf16, #tpu.memory_space<vmem>>, %arg2: memref<16x1xf32, #tpu.memory_space<vmem>>, %arg3: memref<16x1xf32, #tpu.memory_space<vmem>>, %arg4: memref<16x1xf32, #tpu.memory_space<vmem>>, %arg5: memref<16x1xf32, #tpu.memory_space<vmem>>, %arg6: memref<16x128xbf16, #tpu.memory_space<vmem>>) attributes {dimension_semantics = [#tpu.dimension_semantics<parallel>], iteration_bounds = array<i64: 1>, scalar_prefetch = 0 : i64, scratch_operands = 0 : i64, tpu.core_type = #tpu.core_type<tc>, window_params = [{transform_indices = @transform_0, window_bounds = array<i64: 16, 128>}, {pipeline_mode = #tpu.pipeline_mode<synchronous>, transform_indices = @transform_1, window_bounds = array<i64: 16, 1>}, {pipeline_mode = #tpu.pipeline_mode<synchronous>, transform_indices = @transform_2, window_bounds = array<i64: 16, 1>}, {pipeline_mode = #tpu.pipeline_mode<synchronous>, transform_indices = @transform_3, window_bounds = array<i64: 16, 1>}, {pipeline_mode = #tpu.pipeline_mode<synchronous>, transform_indices = @transform_4, window_bounds = array<i64: 16, 1>}, {transform_indices = @transform_5, window_bounds = array<i64: 16, 128>}]} {
    %c0 = arith.constant 0 : index
    %c0_0 = arith.constant 0 : index
    %0 = vector.load %arg1[%c0, %c0_0] : memref<16x128xbf16, #tpu.memory_space<vmem>>, vector<16x128xbf16>
    %1 = arith.extf %0 : vector<16x128xbf16> to vector<16x128xf32>
    %c0_1 = arith.constant 0 : index
    %c0_2 = arith.constant 0 : index
    %2 = vector.load %arg2[%c0_1, %c0_2] : memref<16x1xf32, #tpu.memory_space<vmem>>, vector<16x1xf32>
    %cst = arith.constant 6.250000e-02 : f32
    %3 = vector.broadcast %cst : f32 to vector<16x1xf32>
    %4 = arith.mulf %2, %3 : vector<16x1xf32>
    %c0_3 = arith.constant 0 : index
    %c0_4 = arith.constant 0 : index
    %5 = vector.load %arg3[%c0_3, %c0_4] : memref<16x1xf32, #tpu.memory_space<vmem>>, vector<16x1xf32>
    %cst_5 = arith.constant 6.250000e-02 : f32
    %6 = vector.broadcast %cst_5 : f32 to vector<16x1xf32>
    %7 = arith.mulf %5, %6 : vector<16x1xf32>
    %8 = arith.mulf %4, %4 : vector<16x1xf32>
    %9 = arith.subf %7, %8 : vector<16x1xf32>
    %cst_6 = arith.constant 0.000000e+00 : f32
    %10 = vector.broadcast %cst_6 : f32 to vector<16x1xf32>
    %11 = arith.maximumf %9, %10 : vector<16x1xf32>
    %c0_7 = arith.constant 0 : index
    %c0_8 = arith.constant 0 : index
    %12 = vector.load %arg4[%c0_7, %c0_8] : memref<16x1xf32, #tpu.memory_space<vmem>>, vector<16x1xf32>
    %cst_9 = arith.constant 9.99999974E-6 : f32
    %13 = vector.broadcast %cst_9 : f32 to vector<16x1xf32>
    %14 = arith.addf %11, %13 : vector<16x1xf32>
    %15 = math.rsqrt %14 : vector<16x1xf32>
    %16 = arith.mulf %12, %15 : vector<16x1xf32>
    %17 = vector.broadcast %4 : vector<16x1xf32> to vector<16x128xf32>
    %18 = arith.subf %1, %17 : vector<16x128xf32>
    %19 = vector.broadcast %16 : vector<16x1xf32> to vector<16x128xf32>
    %20 = arith.mulf %18, %19 : vector<16x128xf32>
    %c0_10 = arith.constant 0 : index
    %c0_11 = arith.constant 0 : index
    %21 = vector.load %arg5[%c0_10, %c0_11] : memref<16x1xf32, #tpu.memory_space<vmem>>, vector<16x1xf32>
    %22 = vector.broadcast %21 : vector<16x1xf32> to vector<16x128xf32>
    %23 = arith.addf %20, %22 : vector<16x128xf32>
    %cst_12 = arith.constant 0.000000e+00 : f32
    %24 = vector.broadcast %cst_12 : f32 to vector<16x128xf32>
    %25 = arith.maximumf %23, %24 : vector<16x128xf32>
    %26 = arith.truncf %25 : vector<16x128xf32> to vector<16x128xbf16>
    %c0_13 = arith.constant 0 : index
    %c0_14 = arith.constant 0 : index
    %27 = vector.load %arg6[%c0_13, %c0_14] : memref<16x128xbf16, #tpu.memory_space<vmem>>, vector<16x128xbf16>
    tpu.vector_store %arg6[%c0_13, %c0_14], %26 {strides = array<i32>} : memref<16x128xbf16, #tpu.memory_space<vmem>>, vector<16x128xbf16>,
    return
  }
  func.func @transform_0(%arg0: i32) -> (i32, i32) {
    %c0_i32 = arith.constant 0 : i32
    %c0_i32_0 = arith.constant 0 : i32
    return %c0_i32, %arg0 : i32, i32
  }
  func.func @transform_1(%arg0: i32) -> (i32, i32) {
    %c0_i32 = arith.constant 0 : i32
    %c0_i32_0 = arith.constant 0 : i32
    %c0_i32_1 = arith.constant 0 : i32
    return %c0_i32, %c0_i32_0 : i32, i32
  }
  func.func @transform_2(%arg0: i32) -> (i32, i32) {
    %c0_i32 = arith.constant 0 : i32
    %c0_i32_0 = arith.constant 0 : i32
    %c0_i32_1 = arith.constant 0 : i32
    return %c0_i32, %c0_i32_0 : i32, i32
  }
  func.func @transform_3(%arg0: i32) -> (i32, i32) {
    %c0_i32 = arith.constant 0 : i32
    %c0_i32_0 = arith.constant 0 : i32
    %c0_i32_1 = arith.constant 0 : i32
    return %c0_i32, %c0_i32_0 : i32, i32
  }
  func.func @transform_4(%arg0: i32) -> (i32, i32) {
    %c0_i32 = arith.constant 0 : i32
    %c0_i32_0 = arith.constant 0 : i32
    %c0_i32_1 = arith.constant 0 : i32
    return %c0_i32, %c0_i32_0 : i32, i32
  }
  func.func @transform_5(%arg0: i32) -> (i32, i32) {
    %c0_i32 = arith.constant 0 : i32
    %c0_i32_0 = arith.constant 0 : i32
    return %c0_i32, %arg0 : i32, i32
  }
}

module attributes {stable_mosaic.version = 11 : i64} {
  func.func @matmul_bias_kernel(%arg0: i32, %arg1: memref<8x64xbf16, #tpu.memory_space<vmem>>, %arg2: memref<64x384xbf16, #tpu.memory_space<vmem>>, %arg3: memref<1x384xf32, #tpu.memory_space<vmem>>, %arg4: memref<8x384xf32, #tpu.memory_space<vmem>>) attributes {dimension_semantics = [#tpu.dimension_semantics<parallel>], iteration_bounds = array<i64: 1>, scalar_prefetch = 0 : i64, scratch_operands = 0 : i64, tpu.core_type = #tpu.core_type<tc>, window_params = [{transform_indices = @transform_0, window_bounds = array<i64: 8, 64>}, {pipeline_mode = #tpu.pipeline_mode<synchronous>, transform_indices = @transform_1, window_bounds = array<i64: 64, 384>}, {pipeline_mode = #tpu.pipeline_mode<synchronous>, transform_indices = @transform_2, window_bounds = array<i64: 1, 384>}, {transform_indices = @transform_3, window_bounds = array<i64: 8, 384>}]} {
    %c0 = arith.constant 0 : index
    %c0_0 = arith.constant 0 : index
    %0 = vector.load %arg1[%c0, %c0_0] : memref<8x64xbf16, #tpu.memory_space<vmem>>, vector<8x64xbf16>
    %c0_1 = arith.constant 0 : index
    %c0_2 = arith.constant 0 : index
    %1 = vector.load %arg2[%c0_1, %c0_2] : memref<64x384xbf16, #tpu.memory_space<vmem>>, vector<64x384xbf16>
    %cst = arith.constant dense<0.000000e+00> : vector<8x384xf32>
    %2 = tpu.matmul %0, %1, %cst {dimension_numbers = #tpu.dot_dimension_numbers<[1], [0], [0], [1], [0, 0, 1, 1], [], []>} : vector<8x64xbf16>, vector<64x384xbf16>, vector<8x384xf32> -> vector<8x384xf32>
    %c0_3 = arith.constant 0 : index
    %c0_4 = arith.constant 0 : index
    %3 = vector.load %arg3[%c0_3, %c0_4] : memref<1x384xf32, #tpu.memory_space<vmem>>, vector<1x384xf32>
    %4 = vector.broadcast %3 : vector<1x384xf32> to vector<8x384xf32>
    %5 = arith.addf %2, %4 : vector<8x384xf32>
    %c0_5 = arith.constant 0 : index
    %c0_6 = arith.constant 0 : index
    %6 = vector.load %arg4[%c0_5, %c0_6] : memref<8x384xf32, #tpu.memory_space<vmem>>, vector<8x384xf32>
    tpu.vector_store %arg4[%c0_5, %c0_6], %5 {strides = array<i32>} : memref<8x384xf32, #tpu.memory_space<vmem>>, vector<8x384xf32>,
    return
  }
  func.func @transform_0(%arg0: i32) -> (i32, i32) {
    %c0_i32 = arith.constant 0 : i32
    %c0_i32_0 = arith.constant 0 : i32
    return %arg0, %c0_i32 : i32, i32
  }
  func.func @transform_1(%arg0: i32) -> (i32, i32) {
    %c0_i32 = arith.constant 0 : i32
    %c0_i32_0 = arith.constant 0 : i32
    %c0_i32_1 = arith.constant 0 : i32
    return %c0_i32, %c0_i32_0 : i32, i32
  }
  func.func @transform_2(%arg0: i32) -> (i32, i32) {
    %c0_i32 = arith.constant 0 : i32
    %c0_i32_0 = arith.constant 0 : i32
    %c0_i32_1 = arith.constant 0 : i32
    return %c0_i32, %c0_i32_0 : i32, i32
  }
  func.func @transform_3(%arg0: i32) -> (i32, i32) {
    %c0_i32 = arith.constant 0 : i32
    %c0_i32_0 = arith.constant 0 : i32
    return %arg0, %c0_i32 : i32, i32
  }
}

module attributes {stable_mosaic.version = 11 : i64} {
  func.func @gru_rec_kernel(%arg0: memref<2x2x384xf32, #tpu.memory_space<vmem>>, %arg1: memref<128x384xf32, #tpu.memory_space<vmem>>, %arg2: memref<1x384xf32, #tpu.memory_space<vmem>>, %arg3: memref<2x128xf32, #tpu.memory_space<vmem>>) attributes {dimension_semantics = [], scalar_prefetch = 0 : i64, scratch_operands = 0 : i64, tpu.core_type = #tpu.core_type<tc>} {
    %c0 = arith.constant 0 : index
    %c0_0 = arith.constant 0 : index
    %0 = vector.load %arg1[%c0, %c0_0] : memref<128x384xf32, #tpu.memory_space<vmem>>, vector<128x384xf32>
    %1 = arith.truncf %0 : vector<128x384xf32> to vector<128x384xbf16>
    %c0_1 = arith.constant 0 : index
    %c0_2 = arith.constant 0 : index
    %2 = vector.load %arg2[%c0_1, %c0_2] : memref<1x384xf32, #tpu.memory_space<vmem>>, vector<1x384xf32>
    %cst = arith.constant 0.000000e+00 : f32
    %3 = vector.broadcast %cst : f32 to vector<2x128xf32>
    %c0_i32 = arith.constant 0 : i32
    %4 = arith.index_cast %c0_i32 : i32 to index
    %c0_3 = arith.constant 0 : index
    %c0_4 = arith.constant 0 : index
    %5 = vector.load %arg0[%4, %c0_3, %c0_4] : memref<2x2x384xf32, #tpu.memory_space<vmem>>, vector<1x2x384xf32>
    %6 = vector.shape_cast %5 : vector<1x2x384xf32> to vector<2x384xf32>
    %7 = arith.truncf %3 : vector<2x128xf32> to vector<2x128xbf16>
    %cst_5 = arith.constant dense<0.000000e+00> : vector<2x384xf32>
    %8 = tpu.matmul %7, %1, %cst_5 {dimension_numbers = #tpu.dot_dimension_numbers<[1], [0], [0], [1], [0, 0, 1, 1], [], []>} : vector<2x128xbf16>, vector<128x384xbf16>, vector<2x384xf32> -> vector<2x384xf32>
    %9 = vector.broadcast %2 : vector<1x384xf32> to vector<2x384xf32>
    %10 = arith.addf %8, %9 : vector<2x384xf32>
    %11 = vector.extract_strided_slice %6 {offsets = [0, 0], sizes = [2, 128], strides = [1, 1]} : vector<2x384xf32> to vector<2x128xf32>
    %12 = vector.extract_strided_slice %10 {offsets = [0, 0], sizes = [2, 128], strides = [1, 1]} : vector<2x384xf32> to vector<2x128xf32>
    %13 = arith.addf %11, %12 : vector<2x128xf32>
    %14 = arith.negf %13 : vector<2x128xf32>
    %15 = math.exp %14 : vector<2x128xf32>
    %cst_6 = arith.constant 1.000000e+00 : f32
    %16 = vector.broadcast %cst_6 : f32 to vector<2x128xf32>
    %17 = arith.addf %16, %15 : vector<2x128xf32>
    %18 = arith.divf %16, %17 : vector<2x128xf32>
    %19 = vector.extract_strided_slice %6 {offsets = [0, 128], sizes = [2, 128], strides = [1, 1]} : vector<2x384xf32> to vector<2x128xf32>
    %20 = vector.extract_strided_slice %10 {offsets = [0, 128], sizes = [2, 128], strides = [1, 1]} : vector<2x384xf32> to vector<2x128xf32>
    %21 = arith.addf %19, %20 : vector<2x128xf32>
    %22 = arith.negf %21 : vector<2x128xf32>
    %23 = math.exp %22 : vector<2x128xf32>
    %cst_7 = arith.constant 1.000000e+00 : f32
    %24 = vector.broadcast %cst_7 : f32 to vector<2x128xf32>
    %25 = arith.addf %24, %23 : vector<2x128xf32>
    %26 = arith.divf %24, %25 : vector<2x128xf32>
    %27 = vector.extract_strided_slice %6 {offsets = [0, 256], sizes = [2, 128], strides = [1, 1]} : vector<2x384xf32> to vector<2x128xf32>
    %28 = vector.extract_strided_slice %10 {offsets = [0, 256], sizes = [2, 128], strides = [1, 1]} : vector<2x384xf32> to vector<2x128xf32>
    %29 = arith.mulf %18, %28 : vector<2x128xf32>
    %30 = arith.addf %27, %29 : vector<2x128xf32>
    %31 = math.tanh %30 : vector<2x128xf32>
    %cst_8 = arith.constant 1.000000e+00 : f32
    %32 = vector.broadcast %cst_8 : f32 to vector<2x128xf32>
    %33 = arith.subf %32, %26 : vector<2x128xf32>
    %34 = arith.mulf %33, %31 : vector<2x128xf32>
    %35 = arith.mulf %26, %3 : vector<2x128xf32>
    %36 = arith.addf %34, %35 : vector<2x128xf32>
    %c1_i32 = arith.constant 1 : i32
    %37 = arith.index_cast %c1_i32 : i32 to index
    %c0_9 = arith.constant 0 : index
    %c0_10 = arith.constant 0 : index
    %38 = vector.load %arg0[%37, %c0_9, %c0_10] : memref<2x2x384xf32, #tpu.memory_space<vmem>>, vector<1x2x384xf32>
    %39 = vector.shape_cast %38 : vector<1x2x384xf32> to vector<2x384xf32>
    %40 = arith.truncf %36 : vector<2x128xf32> to vector<2x128xbf16>
    %cst_11 = arith.constant dense<0.000000e+00> : vector<2x384xf32>
    %41 = tpu.matmul %40, %1, %cst_11 {dimension_numbers = #tpu.dot_dimension_numbers<[1], [0], [0], [1], [0, 0, 1, 1], [], []>} : vector<2x128xbf16>, vector<128x384xbf16>, vector<2x384xf32> -> vector<2x384xf32>
    %42 = vector.broadcast %2 : vector<1x384xf32> to vector<2x384xf32>
    %43 = arith.addf %41, %42 : vector<2x384xf32>
    %44 = vector.extract_strided_slice %39 {offsets = [0, 0], sizes = [2, 128], strides = [1, 1]} : vector<2x384xf32> to vector<2x128xf32>
    %45 = vector.extract_strided_slice %43 {offsets = [0, 0], sizes = [2, 128], strides = [1, 1]} : vector<2x384xf32> to vector<2x128xf32>
    %46 = arith.addf %44, %45 : vector<2x128xf32>
    %47 = arith.negf %46 : vector<2x128xf32>
    %48 = math.exp %47 : vector<2x128xf32>
    %cst_12 = arith.constant 1.000000e+00 : f32
    %49 = vector.broadcast %cst_12 : f32 to vector<2x128xf32>
    %50 = arith.addf %49, %48 : vector<2x128xf32>
    %51 = arith.divf %49, %50 : vector<2x128xf32>
    %52 = vector.extract_strided_slice %39 {offsets = [0, 128], sizes = [2, 128], strides = [1, 1]} : vector<2x384xf32> to vector<2x128xf32>
    %53 = vector.extract_strided_slice %43 {offsets = [0, 128], sizes = [2, 128], strides = [1, 1]} : vector<2x384xf32> to vector<2x128xf32>
    %54 = arith.addf %52, %53 : vector<2x128xf32>
    %55 = arith.negf %54 : vector<2x128xf32>
    %56 = math.exp %55 : vector<2x128xf32>
    %cst_13 = arith.constant 1.000000e+00 : f32
    %57 = vector.broadcast %cst_13 : f32 to vector<2x128xf32>
    %58 = arith.addf %57, %56 : vector<2x128xf32>
    %59 = arith.divf %57, %58 : vector<2x128xf32>
    %60 = vector.extract_strided_slice %39 {offsets = [0, 256], sizes = [2, 128], strides = [1, 1]} : vector<2x384xf32> to vector<2x128xf32>
    %61 = vector.extract_strided_slice %43 {offsets = [0, 256], sizes = [2, 128], strides = [1, 1]} : vector<2x384xf32> to vector<2x128xf32>
    %62 = arith.mulf %51, %61 : vector<2x128xf32>
    %63 = arith.addf %60, %62 : vector<2x128xf32>
    %64 = math.tanh %63 : vector<2x128xf32>
    %cst_14 = arith.constant 1.000000e+00 : f32
    %65 = vector.broadcast %cst_14 : f32 to vector<2x128xf32>
    %66 = arith.subf %65, %59 : vector<2x128xf32>
    %67 = arith.mulf %66, %64 : vector<2x128xf32>
    %68 = arith.mulf %59, %36 : vector<2x128xf32>
    %69 = arith.addf %67, %68 : vector<2x128xf32>
    %c2_i32 = arith.constant 2 : i32
    %c0_15 = arith.constant 0 : index
    %c0_16 = arith.constant 0 : index
    %70 = vector.load %arg3[%c0_15, %c0_16] : memref<2x128xf32, #tpu.memory_space<vmem>>, vector<2x128xf32>
    tpu.vector_store %arg3[%c0_15, %c0_16], %69 {strides = array<i32>} : memref<2x128xf32, #tpu.memory_space<vmem>>, vector<2x128xf32>,
    return
  }
}

</mosaic_0001>

<bundles_post_ra>
// kernel: reference_encoder_forward.8
= control target key start
LH: loop header
LB: loop body
LE: loop exit
PB: predicated region body
PF: predicated region fallthrough
CT: control target
= control target key end

     0   :  { %v136_v1 = vmov 0   ;;  %vm35_vm0 = vcmask 130048   ;;  %vm19_vm1 = vcmask 3072   ;;  %v137_v4 = vmov 0.0   ;;  %s197_s1 = inlined_call_operand.vmem [shape: bf16[16,256], index: 1, kind: input, shape index: {}]   ;;  %s198_s0 = inlined_call_operand.vmem [shape: bf16[4,16], index: 0, kind: input, shape index: {}]   ;;  %s199_s3 = inlined_call_operand.vmem [shape: f32[4,1], index: 3, kind: output, shape index: {1}]   ;;  %s200_s2 = inlined_call_operand.vmem [shape: bf16[4,256], index: 2, kind: output, shape index: {0}]   ;;  %s201_s4 = inlined_call_operand.vmem [shape: f32[4,1], index: 4, kind: output, shape index: {2}]  }
   0x1   :  { %v133_v0 = vld [vmem:[%s197_s1 + $0x4] ss:$8 sps:$4 sm:$0xff]   ;;  %71 = vmatprep.mubr.bf16.mxu0 %v136_v1  ;;  %v135_v2 = vld [vmem:[%s197_s1] ss:$8 sps:$4 sm:$0xff]   ;;  %20 = vst.msk [vmem:[%s199_s3] sm:$0xf] %vm19_vm1, %v137_v4 }
   0x2   :  { %53 = vmatprep.subr.bf16.mxu0 %v133_v0  ;;  %v22_v3 = vld [vmem:[%s198_s0] sm:$0x3]  ;;  %vm81_vm2 = vcmask 1043456   ;;  %21 = vst.msk [vmem:[%s201_s4] sm:$0xf] %vm19_vm1, %v137_v4 }
   0x3   :  { %54 = vmatpush1.bf16.msra.mxu0 %v135_v2 }
   0x6   :  { %128 = vmatmul.mubr.msk.bf16.vlgmr.msra.gmra.mxu0 %vm35_vm0, %v22_v3 }
   0x8   :  { %v80_v18 = vld [vmem:[%s199_s3] sm:$0xf] }
   0x9   :  { %v90_v21 = vld [vmem:[%s201_s4] sm:$0xf] }
  0xc6   :  { %v73_v5 = vpop.f32.mrf.mxu0 }
  0xc7   :  { %v91_v6 = vmul.f32 %v73_v5, %v73_v5  ;;  %v82_v10 = vsel %vm81_vm2, %v73_v5, 0.0 }
  0xc8   :  { %v75_v7 = vpop.f32.mrf.mxu0 }
  0xc9   :  { %v92_v8 = vmul.f32 %v75_v7, %v75_v7  ;;  %v129_v9 = vpack.c.bf16 %v75_v7, %v73_v5  ;;  %v83_v11 = vsel %vm81_vm2, %v75_v7, 0.0  ;;  %v93_v16 = vsel %vm81_vm2, %v91_v6, 0.0 }
  0xca   :  { %v77_v12 = vpop.f32.mrf.mxu0  ;;  %v84_v13 = vadd.f32 %v83_v11, %v82_v10 }
  0xcb   :  { %130 = vst.sshfl [vmem:[%s200_s2] sm:$0x33 pattern:$0x76325410] %v129_v9  ;;  %v94_v14 = vsel %vm81_vm2, %v92_v8, 0.0 }
  0xcc   :  { %85 = vadd.xlane.f32.xlu0 %v84_v13  ;;  %v78_v15 = vpop.f32.mrf.mxu0  ;;  %v95_v17 = vadd.f32 %v94_v14, %v93_v16 }
  0xd0   :  { %96 = vadd.xlane.f32.xlu0 %v95_v17 }
 0x155   :  { %v86_v19 = vpop.xlane.xlu0 %85 }
 0x156   :  { %v87_v20 = vadd.f32 %v86_v19, %v80_v18 }
 0x158   :  { %89 = vst.msk [vmem:[%s199_s3] sm:$0xf] %vm19_vm1, %v87_v20 }
 0x159   :  { %v97_v22 = vpop.xlane.xlu0 %96 }
 0x15a   :  { %v98_v23 = vadd.f32 %v97_v22, %v90_v21 }
 0x15c   :  { %99 = vst.msk [vmem:[%s201_s4] sm:$0xf] %vm19_vm1, %v98_v23 }

// kernel: reference_encoder_forward.9
= control target key start
LH: loop header
LB: loop body
LE: loop exit
PB: predicated region body
PF: predicated region fallthrough
CT: control target
= control target key end

     0   :  { %v103_v0 = vmov 0   ;;  %v104_v13 = vmov 839922192   ;;  %v40_v15 = vlaneseq  ;;  %s153_s1 = inlined_call_operand.vmem [shape: f32[4,1], index: 1, kind: input, shape index: {}]   ;;  %s154_s2 = inlined_call_operand.vmem [shape: f32[4,1], index: 2, kind: input, shape index: {}]   ;;  %s155_s4 = inlined_call_operand.vmem [shape: f32[4,1], index: 4, kind: input, shape index: {}]   ;;  %s156_s3 = inlined_call_operand.vmem [shape: f32[4,1], index: 3, kind: input, shape index: {}]   ;;  %s157_s0 = inlined_call_operand.vmem [shape: bf16[4,256], index: 0, kind: input, shape index: {}]   ;;  %s158_s5 = inlined_call_operand.vmem [shape: bf16[4,256], index: 5, kind: output, shape index: {}]  }
   0x1   :  { %99 = vset.pattern.permute.xlu0 %v103_v0  ;;  %v22_v1 = vld [vmem:[%s153_s1] sm:$0xf]  ;;  %100 = vset.pattern.permute.xlu1 %v103_v0  ;;  %v38_v14 = vunpack.c.l.s4 %v104_v13 }
   0x2   :  { %v24_v2 = vld [vmem:[%s154_s2] sm:$0xf]  ;;  %v23_v3 = vmul.f32 0.00390625, %v22_v1  ;;  %v41_v17 = vshrl.u32 %v40_v15, 7 }
   0x3   :  { %v25_v4 = vmul.f32 0.00390625, %v24_v2  ;;  %v59_v5 = vld [vmem:[%s155_s4] sm:$0xf]  ;;  %v39_v16 = vunpack.c.0.s8 %v38_v14 }
   0x4   :  { %62 = vperm.xlu1 %100, %v59_v5   ;;  %35 = vperm.xlu0 %99, %v23_v3   ;;  %v26_v6 = vmul.f32 %v23_v3, %v23_v3  ;;  %v29_v10 = vld [vmem:[%s156_s3] sm:$0xf] }
   0x5   :  { %v42_v18 = vsub.s32 %v39_v16, %v41_v17  ;;  %v20_v20 = vld [vmem:[%s157_s0] sm:$0xf] }
   0x6   :  { %v27_v7 = vsub.f32 %v25_v4, %v26_v6  ;;  %v21_v21 = vunpack.c.l.bf16 %v20_v20 }
   0x8   :  { %v28_v8 = vmax.f32 %v27_v7, 0.0 }
   0xa   :  { %v30_v9 = vadd.f32 1e-05, %v28_v8 }
   0xc   :  { %101 = vrsqrt.f32 %v30_v9 }
  0x19   :  { %v102_v11 = vpop.eup %101 }
  0x1a   :  { %v32_v12 = vmul.f32 %v102_v11, %v29_v10 }
  0x1c   :  { %48 = vperm.xlu0 %99, %v32_v12  }
  0x7f   :  { %v36_v19 = vpop.permute.xlu0 %35  ;;  %v63_v23 = vpop.permute.xlu1 %62 }
  0x80   :  { %v43_v22 = vrot.slane %v36_v19, %v42_v18  ;;  %v70_v27 = vrot.slane %v63_v23, %v42_v18 }
  0x82   :  { %v45_v25 = vsub.f32 %v21_v21, %v43_v22 }
  0x97   :  { %v49_v24 = vpop.permute.xlu0 %48 }
  0x98   :  { %v56_v26 = vrot.slane %v49_v24, %v42_v18 }
  0x9a   :  { %v58_v28 = vmul.f32 %v56_v26, %v45_v25 }
  0x9c   :  { %v72_v29 = vadd.f32 %v70_v27, %v58_v28 }
  0x9e   :  { %v73_v30 = vmax.f32 %v72_v29, 0.0 }
  0xa0   :  { %v75_v31 = vcombine.high %v73_v30, %v73_v30 }
  0xa2   :  { %v95_v32 = vpack.c.bf16 %v75_v31, %v73_v30 }
  0xa4   :  { %96 = vst.sshfl [vmem:[%s158_s5] sm:$0x33 pattern:$0x76325410] %v95_v32 }

// kernel: reference_encoder_forward.10
= control target key start
LH: loop header
LB: loop body
LE: loop exit
PB: predicated region body
PF: predicated region fallthrough
CT: control target
= control target key end

     0   :  { %vm47_vm0 = vcmask 1043456   ;;  %v140_v0 = vmov 0.0   ;;  %vm141_vm1 = vmmov 0   ;;  %vm43_vm2 = vcmask 326656   ;;  %s204_s1 = inlined_call_operand.vmem [shape: bf16[40,128], index: 1, kind: input, shape index: {}]   ;;  %s205_s0 = inlined_call_operand.vmem [shape: bf16[8,40], index: 0, kind: input, shape index: {}]   ;;  %s206_s3 = inlined_call_operand.vmem [shape: f32[8,1], index: 3, kind: output, shape index: {1}]   ;;  %s207_s2 = inlined_call_operand.vmem [shape: bf16[8,128], index: 2, kind: output, shape index: {0}]   ;;  %s208_s4 = inlined_call_operand.vmem [shape: f32[8,1], index: 4, kind: output, shape index: {2}]  }
   0x1   :  { %125 = vmatprep.subr.bf16.mxu0 %v140_v0  ;;  %v137_v1 = vld [vmem:[%s204_s1 + $0x10] ss:$0 sps:$4 sm:$0xff]   ;;  %131 = vmatprep.mubr.msk.bf16.mxu0 %vm141_vm1, %v140_v0  ;;  %v138_v3 = vld [vmem:[%s204_s1 + $0x8] sm:$0xff]   ;;  %v139_v4 = vld [vmem:[%s204_s1] sm:$0xff]   ;;  %vm19_vm3 = vcmask 7168  }
   0x2   :  { %v49_v2 = vsel %vm47_vm0, %v137_v1, 0  ;;  %v22_v5 = vld [vmem:[%s205_s0] sm:$0xf]  ;;  %20 = vst.msk [vmem:[%s206_s3] sm:$0xff] %vm19_vm3, %v140_v0  ;;  %21 = vst.msk [vmem:[%s208_s4] sm:$0xff] %vm19_vm3, %v140_v0 }
   0x3   :  { %126 = vmatpush3.bf16.msra.mxu0 %v49_v2 }
   0x4   :  { %127 = vmatprep.subr.bf16.mxu0 %v140_v0 }
   0x7   :  { %128 = vmatpush3.bf16.msra.mxu0 %v138_v3 }
   0x8   :  { %129 = vmatprep.subr.bf16.mxu0 %v140_v0 }
   0x9   :  { %v91_v12 = vld [vmem:[%s206_s3] sm:$0xff] }
   0xa   :  { %v97_v15 = vld [vmem:[%s208_s4] sm:$0xff] }
   0xb   :  { %130 = vmatpush3.bf16.msra.mxu0 %v139_v4 }
   0xe   :  { %132 = vmatmul.mubr.msk.bf16.vlgmr.msra.gmra.mxu0 %vm43_vm2, %v22_v5 }
  0xce   :  { %v85_v6 = vpop.f32.mrf.mxu0 }
  0xcf   :  { %v103_v7 = vpack.c.bf16 %v85_v6, %v85_v6  ;;  %92 = vadd.xlane.f32.xlu0 %v85_v6  ;;  %v98_v9 = vmul.f32 %v85_v6, %v85_v6 }
  0xd0   :  { %v133_v8 = vpop.f32.mrf.mxu0 }
  0xd1   :  { %104 = vst [vmem:[%s207_s2] sm:$0xf] %v103_v7 }
  0xd2   :  { %v88_v10 = vpop.f32.mrf.mxu0 }
  0xd3   :  { %99 = vadd.xlane.f32.xlu0 %v98_v9 }
  0xd4   :  { %v134_v11 = vpop.f32.mrf.mxu0 }
 0x158   :  { %v93_v13 = vpop.xlane.xlu0 %92 }
 0x159   :  { %v94_v14 = vadd.f32 %v93_v13, %v91_v12 }
 0x15b   :  { %96 = vst.msk [vmem:[%s206_s3] sm:$0xff] %vm19_vm3, %v94_v14 }
 0x15c   :  { %v100_v16 = vpop.xlane.xlu0 %99 }
 0x15d   :  { %v101_v17 = vadd.f32 %v100_v16, %v97_v15 }
 0x15f   :  { %102 = vst.msk [vmem:[%s208_s4] sm:$0xff] %vm19_vm3, %v101_v17 }

// kernel: reference_encoder_forward.11
= control target key start
LH: loop header
LB: loop body
LE: loop exit
PB: predicated region body
PF: predicated region fallthrough
CT: control target
= control target key end

     0   :  { %v64_v0 = vmov 0   ;;  %s113_s1 = inlined_call_operand.vmem [shape: f32[8,1], index: 1, kind: input, shape index: {}]   ;;  %s114_s2 = inlined_call_operand.vmem [shape: f32[8,1], index: 2, kind: input, shape index: {}]   ;;  %s115_s4 = inlined_call_operand.vmem [shape: f32[8,1], index: 4, kind: input, shape index: {}]   ;;  %s116_s3 = inlined_call_operand.vmem [shape: f32[8,1], index: 3, kind: input, shape index: {}]   ;;  %s117_s0 = inlined_call_operand.vmem [shape: bf16[8,128], index: 0, kind: input, shape index: {}]   ;;  %s118_s5 = inlined_call_operand.vmem [shape: bf16[8,128], index: 5, kind: output, shape index: {}]  }
   0x1   :  { %60 = vset.pattern.permute.xlu0 %v64_v0  ;;  %v22_v1 = vld [vmem:[%s113_s1] sm:$0xff]  ;;  %61 = vset.pattern.permute.xlu1 %v64_v0 }
   0x2   :  { %v24_v2 = vld [vmem:[%s114_s2] sm:$0xff]  ;;  %v23_v3 = vmul.f32 0.015625, %v22_v1 }
   0x3   :  { %v25_v4 = vmul.f32 0.015625, %v24_v2  ;;  %v45_v5 = vld [vmem:[%s115_s4] sm:$0xff] }
   0x4   :  { %48 = vperm.xlu1 %61, %v45_v5   ;;  %35 = vperm.xlu0 %60, %v23_v3   ;;  %v26_v6 = vmul.f32 %v23_v3, %v23_v3  ;;  %v29_v10 = vld [vmem:[%s116_s3] sm:$0xff] }
   0x5   :  { %v20_v13 = vld [vmem:[%s117_s0] sm:$0xf] }
   0x6   :  { %v27_v7 = vsub.f32 %v25_v4, %v26_v6  ;;  %v21_v15 = vunpack.c.l.bf16 %v20_v13 }
   0x8   :  { %v28_v8 = vmax.f32 %v27_v7, 0.0 }
   0xa   :  { %v30_v9 = vadd.f32 1e-05, %v28_v8 }
   0xc   :  { %62 = vrsqrt.f32 %v30_v9 }
  0x19   :  { %v63_v11 = vpop.eup %62 }
  0x1a   :  { %v32_v12 = vmul.f32 %v63_v11, %v29_v10 }
  0x1c   :  { %41 = vperm.xlu0 %60, %v32_v12  }
  0x7f   :  { %v36_v14 = vpop.permute.xlu0 %35  ;;  %v49_v18 = vpop.permute.xlu1 %48 }
  0x80   :  { %v38_v16 = vsub.f32 %v21_v15, %v36_v14 }
  0x97   :  { %v42_v17 = vpop.permute.xlu0 %41 }
  0x98   :  { %v44_v19 = vmul.f32 %v42_v17, %v38_v16 }
  0x9a   :  { %v51_v20 = vadd.f32 %v49_v18, %v44_v19 }
  0x9c   :  { %v52_v21 = vmax.f32 %v51_v20, 0.0 }
  0x9e   :  { %v53_v22 = vpack.c.bf16 %v52_v21, %v52_v21 }
  0xa0   :  { %54 = vst [vmem:[%s118_s5] sm:$0xf] %v53_v22 }

// kernel: reference_encoder_forward.12
= control target key start
LH: loop header
LB: loop body
LE: loop exit
PB: predicated region body
PF: predicated region fallthrough
CT: control target
= control target key end

     0   :  { %vm71_vm0 = vcmask 1043456   ;;  %v205_v0 = vmov 0.0   ;;  %vm206_vm1 = vmmov 0   ;;  %vm67_vm2 = vcmask 588800   ;;  %s297_s1 = inlined_call_operand.vmem [shape: bf16[72,128], index: 1, kind: input, shape index: {}]   ;;  %s298_s0 = inlined_call_operand.vmem [shape: bf16[16,72], index: 0, kind: input, shape index: {}]   ;;  %s299_s3 = inlined_call_operand.vmem [shape: f32[16,1], index: 3, kind: output, shape index: {1}]   ;;  %s300_s2 = inlined_call_operand.vmem [shape: bf16[16,128], index: 2, kind: output, shape index: {0}]   ;;  %s301_s4 = inlined_call_operand.vmem [shape: f32[16,1], index: 4, kind: output, shape index: {2}]  }
   0x1   :  { %183 = vmatprep.subr.bf16.mxu0 %v205_v0  ;;  %v199_v1 = vld [vmem:[%s297_s1 + $0x20] ss:$0 sps:$4 sm:$0xff]   ;;  %193 = vmatprep.mubr.msk.bf16.mxu0 %vm206_vm1, %v205_v0  ;;  %v200_v3 = vld [vmem:[%s297_s1 + $0x18] sm:$0xff]   ;;  %v201_v4 = vld [vmem:[%s297_s1 + $0x10] sm:$0xff]   ;;  %vm19_vm3 = vcmask 7168  }
   0x2   :  { %v73_v2 = vsel %vm71_vm0, %v199_v1, 0  ;;  %v202_v5 = vld [vmem:[%s297_s1 + $0x8] sm:$0xff]   ;;  %v203_v6 = vld [vmem:[%s297_s1] sm:$0xff]   ;;  %20 = vst.msk [vmem:[%s299_s3] sm:$0xff] %vm19_vm3, %v205_v0  ;;  %21 = vst.msk [vmem:[%s299_s3 + $0x8] sm:$0xff] %vm19_vm3, %v205_v0 }
   0x3   :  { %184 = vmatpush3.bf16.msra.mxu0 %v73_v2  ;;  %v204_v7 = vld [vmem:[%s298_s0] sm:$0xff]   ;;  %22 = vst.msk [vmem:[%s301_s4] sm:$0xff] %vm19_vm3, %v205_v0  ;;  %23 = vst.msk [vmem:[%s301_s4 + $0x8] sm:$0xff] %vm19_vm3, %v205_v0 }
   0x4   :  { %185 = vmatprep.subr.bf16.mxu0 %v205_v0 }
   0x7   :  { %186 = vmatpush3.bf16.msra.mxu0 %v200_v3 }
   0x8   :  { %187 = vmatprep.subr.bf16.mxu0 %v205_v0 }
   0x9   :  { %v116_v15 = vld [vmem:[%s299_s3] sm:$0xff]  ;;  %v117_v20 = vld [vmem:[%s299_s3 + $0x8] sm:$0xff] }
   0xa   :  { %v127_v17 = vld [vmem:[%s301_s4] sm:$0xff]  ;;  %v128_v23 = vld [vmem:[%s301_s4 + $0x8] sm:$0xff] }
   0xb   :  { %188 = vmatpush3.bf16.msra.mxu0 %v201_v4 }
   0xc   :  { %189 = vmatprep.subr.bf16.mxu0 %v205_v0 }
   0xf   :  { %190 = vmatpush3.bf16.msra.mxu0 %v202_v5 }
  0x10   :  { %191 = vmatprep.subr.bf16.mxu0 %v205_v0 }
  0x13   :  { %192 = vmatpush3.bf16.msra.mxu0 %v203_v6 }
  0x16   :  { %194 = vmatmul.mubr.msk.bf16.vlgmr.msra.gmra.mxu0 %vm67_vm2, %v204_v7 }
  0xd6   :  { %v109_v8 = vpop.f32.mrf.mxu0 }
  0xd7   :  { %118 = vadd.xlane.f32.xlu0 %v109_v8  ;;  %v129_v9 = vmul.f32 %v109_v8, %v109_v8 }
  0xd8   :  { %v195_v10 = vpop.f32.mrf.mxu0 }
  0xd9   :  { %131 = vadd.xlane.f32.xlu1 %v129_v9 }
  0xda   :  { %v112_v11 = vpop.f32.mrf.mxu0 }
  0xdb   :  { %v175_v12 = vpack.c.bf16 %v112_v11, %v109_v8  ;;  %120 = vadd.xlane.f32.xlu0 %v112_v11  ;;  %v130_v13 = vmul.f32 %v112_v11, %v112_v11 }
  0xdc   :  { %v196_v14 = vpop.f32.mrf.mxu0 }
  0xdd   :  { %176 = vst [vmem:[%s300_s2] sm:$0xff] %v175_v12   ;;  %133 = vadd.xlane.f32.xlu1 %v130_v13 }
 0x160   :  { %v119_v16 = vpop.xlane.xlu0 %118 }
 0x161   :  { %v122_v18 = vadd.f32 %v119_v16, %v116_v15 }
 0x162   :  { %v132_v19 = vpop.xlane.xlu1 %131 }
 0x163   :  { %125 = vst.msk [vmem:[%s299_s3] sm:$0xff] %vm19_vm3, %v122_v18  ;;  %v135_v21 = vadd.f32 %v132_v19, %v127_v17 }
 0x164   :  { %v121_v22 = vpop.xlane.xlu0 %120 }
 0x165   :  { %137 = vst.msk [vmem:[%s301_s4] sm:$0xff] %vm19_vm3, %v135_v21  ;;  %v123_v24 = vadd.f32 %v121_v22, %v117_v20 }
 0x166   :  { %v134_v25 = vpop.xlane.xlu1 %133 }
 0x167   :  { %126 = vst.msk [vmem:[%s299_s3 + $0x8] sm:$0xff] %vm19_vm3, %v123_v24  ;;  %v136_v26 = vadd.f32 %v134_v25, %v128_v23 }
 0x169   :  { %138 = vst.msk [vmem:[%s301_s4 + $0x8] sm:$0xff] %vm19_vm3, %v136_v26 }

// kernel: reference_encoder_forward.13
= control target key start
LH: loop header
LB: loop body
LE: loop exit
PB: predicated region body
PF: predicated region fallthrough
CT: control target
= control target key end

     0   :  { %v120_v0 = vmov 0   ;;  %s181_s1 = inlined_call_operand.vmem [shape: f32[16,1], index: 1, kind: input, shape index: {}]   ;;  %s182_s2 = inlined_call_operand.vmem [shape: f32[16,1], index: 2, kind: input, shape index: {}]   ;;  %s183_s4 = inlined_call_operand.vmem [shape: f32[16,1], index: 4, kind: input, shape index: {}]   ;;  %s184_s3 = inlined_call_operand.vmem [shape: f32[16,1], index: 3, kind: input, shape index: {}]   ;;  %s185_s0 = inlined_call_operand.vmem [shape: bf16[16,128], index: 0, kind: input, shape index: {}]   ;;  %s186_s5 = inlined_call_operand.vmem [shape: bf16[16,128], index: 5, kind: output, shape index: {}]  }
   0x1   :  { %114 = vset.pattern.permute.xlu0 %v120_v0  ;;  %v24_v1 = vld [vmem:[%s181_s1] sm:$0xff]  ;;  %v25_v2 = vld [vmem:[%s181_s1 + $0x8] sm:$0xff]  ;;  %115 = vset.pattern.permute.xlu1 %v120_v0 }
   0x2   :  { %v28_v3 = vld [vmem:[%s182_s2] sm:$0xff]  ;;  %v26_v4 = vmul.f32 0.0625, %v24_v1  ;;  %v29_v5 = vld [vmem:[%s182_s2 + $0x8] sm:$0xff]  ;;  %v27_v7 = vmul.f32 0.0625, %v25_v2 }
   0x3   :  { %v30_v6 = vmul.f32 0.0625, %v28_v3  ;;  %v31_v8 = vmul.f32 0.0625, %v29_v5  ;;  %v70_v15 = vld [vmem:[%s183_s4] sm:$0xff]  ;;  %v39_v20 = vld [vmem:[%s184_s3 + $0x8] sm:$0xff] }
   0x4   :  { %48 = vperm.xlu0 %114, %v26_v4   ;;  %v32_v9 = vmul.f32 %v26_v4, %v26_v4  ;;  %v33_v10 = vmul.f32 %v27_v7, %v27_v7  ;;  %v38_v18 = vld [vmem:[%s184_s3] sm:$0xff]  ;;  %v71_v24 = vld [vmem:[%s183_s4 + $0x8] sm:$0xff] }
   0x5   :  { %v105_v25 = vld [vmem:[%s185_s0] sm:$0xff]  }
   0x6   :  { %v34_v11 = vsub.f32 %v30_v6, %v32_v9  ;;  %v35_v12 = vsub.f32 %v31_v8, %v33_v10  ;;  %v106_v27 = vunpack.c.l.bf16 %v105_v25  ;;  %v107_v31 = vunpack.c.h.bf16 %v105_v25 }
   0x8   :  { %v36_v13 = vmax.f32 %v34_v11, 0.0  ;;  %v37_v14 = vmax.f32 %v35_v12, 0.0  ;;  %53 = vperm.xlu0 %114, %v27_v7  }
   0xa   :  { %v40_v16 = vadd.f32 1e-05, %v36_v13  ;;  %v41_v17 = vadd.f32 1e-05, %v37_v14 }
   0xc   :  { %116 = vrsqrt.f32 %v40_v16  ;;  %74 = vperm.xlu0 %114, %v70_v15  }
   0xd   :  { %118 = vrsqrt.f32 %v41_v17 }
  0x19   :  { %v117_v19 = vpop.eup %116 }
  0x1a   :  { %v119_v21 = vpop.eup %118  ;;  %v44_v22 = vmul.f32 %v117_v19, %v38_v18 }
  0x1b   :  { %v45_v23 = vmul.f32 %v119_v21, %v39_v20 }
  0x1c   :  { %60 = vperm.xlu1 %115, %v44_v22  }
  0x20   :  { %65 = vperm.xlu1 %115, %v45_v23  }
  0x24   :  { %79 = vperm.xlu1 %115, %v71_v24  }
  0x7f   :  { %v49_v26 = vpop.permute.xlu0 %48 }
  0x80   :  { %v56_v28 = vsub.f32 %v106_v27, %v49_v26 }
  0x83   :  { %v54_v29 = vpop.permute.xlu0 %53 }
  0x84   :  { %v57_v34 = vsub.f32 %v107_v31, %v54_v29 }
  0x87   :  { %v75_v35 = vpop.permute.xlu0 %74 }
  0x97   :  { %v61_v30 = vpop.permute.xlu1 %60 }
  0x98   :  { %v68_v32 = vmul.f32 %v61_v30, %v56_v28 }
  0x9a   :  { %v82_v36 = vadd.f32 %v75_v35, %v68_v32 }
  0x9b   :  { %v66_v33 = vpop.permute.xlu1 %65 }
  0x9c   :  { %v69_v37 = vmul.f32 %v66_v33, %v57_v34  ;;  %v84_v40 = vmax.f32 %v82_v36, 0.0 }
  0x9f   :  { %v80_v38 = vpop.permute.xlu1 %79 }
  0xa0   :  { %v83_v39 = vadd.f32 %v80_v38, %v69_v37 }
  0xa2   :  { %v85_v41 = vmax.f32 %v83_v39, 0.0 }
  0xa4   :  { %v111_v42 = vpack.c.bf16 %v85_v41, %v84_v40 }
  0xa6   :  { %112 = vst [vmem:[%s186_s5] sm:$0xff] %v111_v42  }

// kernel: reference_encoder_forward.14
= control target key start
LH: loop header
LB: loop body
LE: loop exit
PB: predicated region body
PF: predicated region fallthrough
CT: control target
= control target key end

     0   :  { %v255_v0 = vmov 0.0   ;;  %vm256_vm0 = vmmov 0   ;;  %v257_v3 = vmov 0   ;;  %vm113_vm1 = vcmask 523264   ;;  %s329_s1 = inlined_call_operand.vmem [shape: bf16[64,384], index: 1, kind: input, shape index: {}]   ;;  %s330_s0 = inlined_call_operand.vmem [shape: bf16[8,64], index: 0, kind: input, shape index: {}]   ;;  %s331_s2 = inlined_call_operand.vmem [shape: f32[1,384], index: 2, kind: input, shape index: {}]   ;;  %s332_s3 = inlined_call_operand.vmem [shape: f32[8,384], index: 3, kind: output, shape index: {}]  }
   0x1   :  { %224 = vmatprep.subr.bf16.mxu1 %v255_v0  ;;  %v239_v1 = vld [vmem:[%s329_s1 + $0x4c] ss:$12 sps:$4 sm:$0xff]   ;;  %232 = vmatprep.mubr.msk.bf16.mxu1 %vm256_vm0, %v255_v0  ;;  %v241_v2 = vld [vmem:[%s329_s1 + $0x50] ss:$12 sps:$4 sm:$0xff]   ;;  %v242_v4 = vld [vmem:[%s329_s1 + $0x48] ss:$12 sps:$4 sm:$0xff]   ;;  %v34_v15 = vlaneseq }
   0x2   :  { %149 = vmatprep.mubr.bf16.mxu0 %v257_v3  ;;  %125 = vmatprep.subr.bf16.mxu0 %v239_v1  ;;  %v243_v5 = vld [vmem:[%s329_s1 + $0x34] ss:$12 sps:$4 sm:$0xff]   ;;  %v245_v6 = vld [vmem:[%s329_s1 + $0x38] ss:$12 sps:$4 sm:$0xff]   ;;  %v246_v7 = vld [vmem:[%s329_s1 + $0x30] ss:$12 sps:$4 sm:$0xff]  }
   0x3   :  { %225 = vmatpush3.bf16.msra.mxu1 %v241_v2  ;;  %126 = vmatpush1.bf16.msra.mxu0 %v242_v4  ;;  %v247_v8 = vld [vmem:[%s329_s1 + $0x1c] ss:$12 sps:$4 sm:$0xff]   ;;  %v249_v9 = vld [vmem:[%s329_s1 + $0x20] ss:$12 sps:$4 sm:$0xff]   ;;  %v250_v10 = vld [vmem:[%s329_s1 + $0x18] ss:$12 sps:$4 sm:$0xff]  }
   0x4   :  { %226 = vmatprep.subr.bf16.mxu1 %v255_v0  ;;  %127 = vmatprep.subr.bf16.mxu0 %v243_v5  ;;  %v251_v11 = vld [vmem:[%s329_s1 + $0x4] ss:$12 sps:$4 sm:$0xff]   ;;  %v253_v12 = vld [vmem:[%s329_s1 + $0x8] ss:$12 sps:$4 sm:$0xff]   ;;  %v254_v13 = vld [vmem:[%s329_s1] ss:$12 sps:$4 sm:$0xff]  }
   0x5   :  { %v15_v14 = vld [vmem:[%s330_s0] sm:$0xf]  ;;  %v35_v16 = vshrl.u32 %v34_v15, 7 }
   0x6   :  { %v32_v18 = vld [vmem:[%s331_s2] sm:$0x7] }
   0x7   :  { %227 = vmatpush3.bf16.msra.mxu1 %v245_v6  ;;  %128 = vmatpush1.bf16.msra.mxu0 %v246_v7  ;;  %v44_v17 = vsub.s32 2, %v35_v16  ;;  %v36_v19 = vsub.s32 0, %v35_v16  ;;  %v40_v20 = vsub.s32 1, %v35_v16 }
   0x8   :  { %228 = vmatprep.subr.bf16.mxu1 %v255_v0  ;;  %129 = vmatprep.subr.bf16.mxu0 %v247_v8 }
   0x9   :  { %v45_v21 = vrot.slane %v32_v18, %v44_v17  ;;  %v37_v22 = vrot.slane %v32_v18, %v36_v19  ;;  %v41_v24 = vrot.slane %v32_v18, %v40_v20 }
   0xb   :  { %229 = vmatpush3.bf16.msra.mxu1 %v249_v9  ;;  %130 = vmatpush1.bf16.msra.mxu0 %v250_v10 }
   0xc   :  { %230 = vmatprep.subr.bf16.mxu1 %v255_v0  ;;  %131 = vmatprep.subr.bf16.mxu0 %v251_v11 }
   0xf   :  { %231 = vmatpush3.bf16.msra.mxu1 %v253_v12  ;;  %132 = vmatpush1.bf16.msra.mxu0 %v254_v13 }
  0x12   :  { %233 = vmatmul.mubr.msk.bf16.vlgmr.msra.gmra.mxu1 %vm113_vm1, %v15_v14  ;;  %217 = vmatmul.mubr.msk.bf16.vlgmr.msra.gmra.mxu0 %vm113_vm1, %v15_v14 }
  0xd2   :  { %v192_v23 = vpop.f32.mrf.mxu1  ;;  %v151_v26 = vpop.f32.mrf.mxu0 }
  0xd3   :  { %v193_v25 = vadd.f32 %v192_v23, %v45_v21  ;;  %v152_v27 = vadd.f32 %v151_v26, %v37_v22 }
  0xd4   :  { %v234_v28 = vpop.f32.mrf.mxu1  ;;  %v153_v29 = vpop.f32.mrf.mxu0 }
  0xd5   :  { %200 = vst [vmem:[%s332_s3 + $0x10] sm:$0xff] %v193_v25  ;;  %198 = vst [vmem:[%s332_s3] sm:$0xff] %v152_v27  ;;  %v154_v30 = vadd.f32 %v153_v29, %v41_v24 }
  0xd6   :  { %v195_v31 = vpop.f32.mrf.mxu1  ;;  %v155_v32 = vpop.f32.mrf.mxu0 }
  0xd7   :  { %199 = vst [vmem:[%s332_s3 + $0x8] sm:$0xff] %v154_v30 }
  0xd8   :  { %v235_v33 = vpop.f32.mrf.mxu1  ;;  %v156_v34 = vpop.f32.mrf.mxu0 }

// kernel: reference_encoder_forward.15
= control target key start
LH: loop header
LB: loop body
LE: loop exit
PB: predicated region body
PF: predicated region fallthrough
CT: control target
= control target key end

     0   :  { %v447_v7 = vmov 0.0   ;;  %v448_v8 = vmov 0   ;;  %vm449_vm0 = vmmov 0   ;;  %s707_s0 = inlined_call_operand.vmem [shape: f32[2,2,384], index: 0, kind: input, shape index: {}]   ;;  %s708_s1 = inlined_call_operand.vmem [shape: f32[128,384], index: 1, kind: input, shape index: {}]   ;;  %s709_s2 = inlined_call_operand.vmem [shape: f32[1,384], index: 2, kind: input, shape index: {}]   ;;  %s710_s3 = inlined_call_operand.hbm [shape: f32[2,128], index: 3, kind: output, shape index: {}]  }
   0x1   :  { %v59_v0 = vld [vmem:[%s708_s1 + $0x158] sm:$0xff]  ;;  %v62_v1 = vld [vmem:[%s708_s1 + $0x170] sm:$0xff]  ;;  %v61_v4 = vld [vmem:[%s708_s1 + $0x168] sm:$0xff]  ;;  %361 = vmatprep.subr.bf16.mxu1 %v447_v7  ;;  %138 = vmatprep.mubr.bf16.mxu0 %v448_v8 }
   0x2   :  { %v58_v2 = vld [vmem:[%s708_s1 + $0x150] sm:$0xff]  ;;  %v480_v3 = vpack.c.bf16 %v62_v1, %v59_v0  ;;  %v53_v5 = vld [vmem:[%s708_s1 + $0x128] sm:$0xff]  ;;  %v56_v6 = vld [vmem:[%s708_s1 + $0x140] sm:$0xff]  ;;  %377 = vmatprep.mubr.msk.bf16.mxu1 %vm449_vm0, %v447_v7 }
   0x3   :  { %v493_v9 = vpack.c.bf16 %v61_v4, %v58_v2  ;;  %v495_v10 = vpack.c.bf16 %v56_v6, %v53_v5  ;;  %v52_v11 = vld [vmem:[%s708_s1 + $0x120] sm:$0xff]  ;;  %v55_v12 = vld [vmem:[%s708_s1 + $0x138] sm:$0xff]  ;;  %v50_v14 = vld [vmem:[%s708_s1 + $0x110] sm:$0xff] }
   0x4   :  { %v47_v13 = vld [vmem:[%s708_s1 + $0xf8] sm:$0xff]  ;;  %106 = vmatprep.subr.bf16.mxu0 %v480_v3  ;;  %v513_v15 = vpack.c.bf16 %v55_v12, %v52_v11  ;;  %v46_v17 = vld [vmem:[%s708_s1 + $0xf0] sm:$0xff]  ;;  %v49_v18 = vld [vmem:[%s708_s1 + $0x108] sm:$0xff] }
   0x5   :  { %107 = vmatpush1.bf16.msra.mxu0 %v493_v9  ;;  %v516_v16 = vpack.c.bf16 %v50_v14, %v47_v13  ;;  %v41_v19 = vld [vmem:[%s708_s1 + $0xc8] sm:$0xff]  ;;  %v44_v20 = vld [vmem:[%s708_s1 + $0xe0] sm:$0xff]  ;;  %v531_v21 = vpack.c.bf16 %v49_v18, %v46_v17  ;;  %v43_v24 = vld [vmem:[%s708_s1 + $0xd8] sm:$0xff] }
   0x6   :  { %108 = vmatprep.subr.bf16.mxu0 %v495_v10  ;;  %v534_v22 = vpack.c.bf16 %v44_v20, %v41_v19  ;;  %v40_v23 = vld [vmem:[%s708_s1 + $0xc0] sm:$0xff]  ;;  %v35_v25 = vld [vmem:[%s708_s1 + $0x98] sm:$0xff]  ;;  %v38_v26 = vld [vmem:[%s708_s1 + $0xb0] sm:$0xff] }
   0x7   :  { %v60_v27 = vld [vmem:[%s708_s1 + $0x160] sm:$0xff]  ;;  %v63_v28 = vld [vmem:[%s708_s1 + $0x178] sm:$0xff]  ;;  %v54_v29 = vld [vmem:[%s708_s1 + $0x130] sm:$0xff]  ;;  %v561_v31 = vpack.c.bf16 %v43_v24, %v40_v23  ;;  %v566_v33 = vpack.c.bf16 %v38_v26, %v35_v25 }
   0x8   :  { %v57_v30 = vld [vmem:[%s708_s1 + $0x148] sm:$0xff]  ;;  %v563_v32 = vpack.c.bf16 %v63_v28, %v60_v27  ;;  %v34_v34 = vld [vmem:[%s708_s1 + $0x90] sm:$0xff]  ;;  %v32_v37 = vld [vmem:[%s708_s1 + $0x80] sm:$0xff] }
   0x9   :  { %109 = vmatpush1.bf16.msra.mxu0 %v513_v15  ;;  %v37_v35 = vld [vmem:[%s708_s1 + $0xa8] sm:$0xff]  ;;  %v581_v38 = vpack.c.bf16 %v57_v30, %v54_v29  ;;  %v48_v39 = vld [vmem:[%s708_s1 + $0x100] sm:$0xff]  ;;  %v51_v40 = vld [vmem:[%s708_s1 + $0x118] sm:$0xff] }
   0xa   :  { %110 = vmatprep.subr.bf16.mxu0 %v516_v16  ;;  %v29_v36 = vld [vmem:[%s708_s1 + $0x68] sm:$0xff]  ;;  %362 = vmatpush3.bf16.msra.mxu1 %v563_v32  ;;  %v591_v41 = vpack.c.bf16 %v37_v35, %v34_v34 }
   0xb   :  { %363 = vmatprep.subr.bf16.mxu1 %v447_v7 }
   0xd   :  { %111 = vmatpush1.bf16.msra.mxu0 %v531_v21 }
   0xe   :  { %112 = vmatprep.subr.bf16.mxu0 %v534_v22 }
  0x11   :  { %113 = vmatpush1.bf16.msra.mxu0 %v561_v31 }
  0x12   :  { %8 = vsyncpa [#allocation3], 0  ;;  %114 = vmatprep.subr.bf16.mxu0 %v566_v33  ;;  %v594_v42 = vpack.c.bf16 %v32_v37, %v29_v36  ;;  %v28_v43 = vld [vmem:[%s708_s1 + $0x60] sm:$0xff]  ;;  %v31_v44 = vld [vmem:[%s708_s1 + $0x78] sm:$0xff]  ;;  %364 = vmatpush3.bf16.msra.mxu1 %v581_v38  ;;  %v609_v47 = vpack.c.bf16 %v51_v40, %v48_v39 }
  0x13   :  { %v23_v45 = vld [vmem:[%s708_s1 + $0x38] sm:$0xff]  ;;  %v26_v46 = vld [vmem:[%s708_s1 + $0x50] sm:$0xff]  ;;  %365 = vmatprep.subr.bf16.mxu1 %v447_v7  ;;  %v45_v49 = vld [vmem:[%s708_s1 + $0xe8] sm:$0xff]  ;;  %v70_v50 = vpack.c.bf16 %v31_v44, %v28_v43 }
  0x14   :  { %v42_v48 = vld [vmem:[%s708_s1 + $0xd0] sm:$0xff]  ;;  %v68_v51 = vpack.c.bf16 %v26_v46, %v23_v45  ;;  %v25_v53 = vld [vmem:[%s708_s1 + $0x48] sm:$0xff]  ;;  %v20_v55 = vld [vmem:[%s708_s1 + $0x20] sm:$0xff] }
  0x15   :  { %115 = vmatpush1.bf16.msra.mxu0 %v591_v41  ;;  %v22_v52 = vld [vmem:[%s708_s1 + $0x30] sm:$0xff]  ;;  %v17_v54 = vld [vmem:[%s708_s1 + $0x8] sm:$0xff]  ;;  %v78_v56 = vpack.c.bf16 %v45_v49, %v42_v48  ;;  %v36_v57 = vld [vmem:[%s708_s1 + $0xa0] sm:$0xff] }
  0x16   :  { %116 = vmatprep.subr.bf16.mxu0 %v594_v42  ;;  %366 = vmatpush3.bf16.msra.mxu1 %v609_v47  ;;  %v39_v58 = vld [vmem:[%s708_s1 + $0xb8] sm:$0xff]  ;;  %v67_v59 = vpack.c.bf16 %v25_v53, %v22_v52  ;;  %v65_v60 = vpack.c.bf16 %v20_v55, %v17_v54  ;;  %v16_v61 = vld [vmem:[%s708_s1] sm:$0xff]  ;;  %v30_v0 = vld [vmem:[%s708_s1 + $0x70] sm:$0xff] }
  0x17   :  { %367 = vmatprep.subr.bf16.mxu1 %v447_v7  ;;  %v19_v62 = vld [vmem:[%s708_s1 + $0x18] sm:$0xff]  ;;  %v75_v63 = vpack.c.bf16 %v39_v58, %v36_v57  ;;  %v33_v1 = vld [vmem:[%s708_s1 + $0x88] sm:$0xff]  ;;  %v24_v5 = vld [vmem:[%s708_s1 + $0x40] sm:$0xff] }
  0x18   :  { %v64_v2 = vpack.c.bf16 %v19_v62, %v16_v61  ;;  %v72_v4 = vpack.c.bf16 %v33_v1, %v30_v0  ;;  %v27_v6 = vld [vmem:[%s708_s1 + $0x58] sm:$0xff]  ;;  %v18_v12 = vld [vmem:[%s708_s1 + $0x10] sm:$0xff]  ;;  %v21_v13 = vld [vmem:[%s708_s1 + $0x28] sm:$0xff] }
  0x19   :  { %117 = vmatpush1.bf16.msra.mxu0 %v70_v50  ;;  %v69_v11 = vpack.c.bf16 %v27_v6, %v24_v5  ;;  %v88_v14 = vld [vmem:[%s709_s2] sm:$0x7] }
  0x1a   :  { %118 = vmatprep.subr.bf16.mxu0 %v68_v51  ;;  %368 = vmatpush3.bf16.msra.mxu1 %v78_v56  ;;  %v89_v17 = vld [vmem:[%s707_s0] sm:$0x3f] }
  0x1b   :  { %369 = vmatprep.subr.bf16.mxu1 %v447_v7  ;;  %v195_v25 = vrot.slane %v89_v17, 2  ;;  %v205_v40 = vrot.slane %v89_v17, 4 }
  0x1d   :  { %119 = vmatpush1.bf16.msra.mxu0 %v67_v59 }
  0x1e   :  { %120 = vmatprep.subr.bf16.mxu0 %v65_v60  ;;  %370 = vmatpush3.bf16.msra.mxu1 %v75_v63 }
  0x1f   :  { %371 = vmatprep.subr.bf16.mxu1 %v447_v7 }
  0x21   :  { %121 = vmatpush1.bf16.msra.mxu0 %v64_v2 }
  0x22   :  { %216 = vmatprep.subr.bf16.mxu0 %v480_v3  ;;  %372 = vmatpush3.bf16.msra.mxu1 %v72_v4  ;;  %v66_v3 = vpack.c.bf16 %v21_v13, %v18_v12 }
  0x23   :  { %373 = vmatprep.subr.bf16.mxu1 %v447_v7 }
  0x24   :  { %139 = vmatmul.mubr.bf16.vlgmr.msra.gmra.mxu0 %v448_v8 }
  0x25   :  { %217 = vmatpush1.bf16.msra.mxu0 %v493_v9  ;;  %248 = vmatprep.mubr.bf16.mxu0 %v448_v8 }
  0x26   :  { %218 = vmatprep.subr.bf16.mxu0 %v495_v10  ;;  %374 = vmatpush3.bf16.msra.mxu1 %v69_v11 }
  0x27   :  { %375 = vmatprep.subr.bf16.mxu1 %v447_v7 }
  0x29   :  { %219 = vmatpush1.bf16.msra.mxu0 %v513_v15 }
  0x2a   :  { %220 = vmatprep.subr.bf16.mxu0 %v516_v16  ;;  %376 = vmatpush3.bf16.msra.mxu1 %v66_v3 }
  0x2b   :  { %381 = vmatprep.subr.bf16.mxu1 %v447_v7 }
  0x2d   :  { %221 = vmatpush1.bf16.msra.mxu0 %v531_v21  ;;  %378 = vmatmul.mubr.bf16.vlgmr.msra.gmra.mxu1 %v448_v8  ;;  %v91_v8 = vlaneseq }
  0x2e   :  { %222 = vmatprep.subr.bf16.mxu0 %v534_v22  ;;  %382 = vmatpush3.bf16.msra.mxu1 %v563_v32 }
  0x2f   :  { %397 = vmatprep.mubr.msk.bf16.mxu1 %vm449_vm0, %v447_v7  ;;  %383 = vmatprep.subr.bf16.mxu1 %v447_v7  ;;  %v92_v9 = vshrl.u32 %v91_v8, 7 }
  0x31   :  { %223 = vmatpush1.bf16.msra.mxu0 %v561_v31  ;;  %v93_v10 = vsub.s32 0, %v92_v9  ;;  %v97_v16 = vsub.s32 1, %v92_v9  ;;  %v101_v35 = vsub.s32 2, %v92_v9 }
  0x32   :  { %224 = vmatprep.subr.bf16.mxu0 %v566_v33  ;;  %384 = vmatpush3.bf16.msra.mxu1 %v581_v38 }
  0x33   :  { %385 = vmatprep.subr.bf16.mxu1 %v447_v7  ;;  %v94_v15 = vrot.slane %v88_v14, %v93_v10  ;;  %v98_v20 = vrot.slane %v88_v14, %v97_v16  ;;  %v102_v36 = vrot.slane %v88_v14, %v101_v35 }
  0x35   :  { %225 = vmatpush1.bf16.msra.mxu0 %v591_v41 }
  0x36   :  { %226 = vmatprep.subr.bf16.mxu0 %v594_v42  ;;  %386 = vmatpush3.bf16.msra.mxu1 %v609_v47 }
  0x37   :  { %387 = vmatprep.subr.bf16.mxu1 %v447_v7 }
  0x39   :  { %227 = vmatpush1.bf16.msra.mxu0 %v70_v50 }
  0x3a   :  { %228 = vmatprep.subr.bf16.mxu0 %v68_v51  ;;  %388 = vmatpush3.bf16.msra.mxu1 %v78_v56  ;;  %v340_v51 = vld [vmem:[%s707_s0 + $0x6] sm:$0x3f]  ;;  %s450_s0 = smov [#allocation2]  }
  0x3b   :  { %389 = vmatprep.subr.bf16.mxu1 %v447_v7  ;;  %v305_v62 = vrot.slane %v340_v51, 2  ;;  %v315_v13 = vrot.slane %v340_v51, 4  ;;  %s330_s4 = sshll.u32 %s450_s0, 4  ;;  %s331_s4 = int_to_ptr.vmem [resolvable:$true] %s330_s4 }
  0x3c   :  { %s425_s5 = scalar_lea.vmem %s331_s4, 32  ;;  %p430_p1 = scmp.lt.s32.totalorder %s331_s4, %s331_s4 }
  0x3d   :  { %229 = vmatpush1.bf16.msra.mxu0 %v67_v59  ;;  %p426_p0 = scmp.ne.s32.totalorder %s331_s4, %s425_s5  ;;  %p431_p2 = scmp.lt.s32.totalorder %s425_s5, %s425_s5 }
  0x3e   :  { %230 = vmatprep.subr.bf16.mxu0 %v65_v60  ;;  %390 = vmatpush3.bf16.msra.mxu1 %v75_v63 }
  0x3f   :  { %391 = vmatprep.subr.bf16.mxu1 %v447_v7  ;;  %p432_p3 = por %p431_p2, %p430_p1 }
  0x41   :  { %231 = vmatpush1.bf16.msra.mxu0 %v64_v2  ;;  %p433_p4 = pnand %p432_p3, %p426_p0 }
  0x42   :  { %392 = vmatpush3.bf16.msra.mxu1 %v72_v4 }
  0x43   :  { %393 = vmatprep.subr.bf16.mxu1 %v447_v7 }
  0x46   :  { %394 = vmatpush3.bf16.msra.mxu1 %v69_v11 }
  0x47   :  { %395 = vmatprep.subr.bf16.mxu1 %v447_v7 }
  0x4a   :  { %396 = vmatpush3.bf16.msra.mxu1 %v66_v3 }
  0xe4   :  { %v140_v18 = vpop.f32.mrf.mxu0 }
  0xe5   :  { %v141_v19 = vadd.f32 %v140_v18, %v94_v15 }
  0xe6   :  { %v142_v21 = vpop.f32.mrf.mxu0 }
  0xe7   :  { %v187_v22 = vadd.f32 %v141_v19, %v89_v17  ;;  %v143_v24 = vadd.f32 %v142_v21, %v98_v20 }
  0xe8   :  { %v144_v7 = vpop.f32.mrf.mxu0 }
  0xe9   :  { %v338_v23 = vmul.f32 -1.442695, %v187_v22  ;;  %v197_v27 = vadd.f32 %v195_v25, %v143_v24 }
  0xea   :  { %v145_v26 = vpop.f32.mrf.mxu0 }
  0xeb   :  { %405 = vpow2.f32 %v338_v23  ;;  %v339_v30 = vmul.f32 -1.442695, %v197_v27 }
  0xed   :  { %v181_v28 = vpop.f32.mrf.mxu1  ;;  %407 = vpow2.f32 %v339_v30 }
  0xee   :  { %v182_v39 = vadd.f32 %v181_v28, %v102_v36 }
  0xef   :  { %v379_v29 = vpop.f32.mrf.mxu1 }
  0xf1   :  { %v184_v31 = vpop.f32.mrf.mxu1 }
  0xf3   :  { %v380_v32 = vpop.f32.mrf.mxu1 }
  0xf8   :  { %v406_v33 = vpop.eup %405 }
  0xf9   :  { %v191_v34 = vadd.f32 1.0, %v406_v33 }
  0xfa   :  { %v408_v37 = vpop.eup %407 }
  0xfb   :  { %409 = vrcp.f32 %v191_v34  ;;  %v201_v38 = vadd.f32 1.0, %v408_v37 }
  0xfd   :  { %411 = vrcp.f32 %v201_v38 }
 0x108   :  { %v410_v41 = vpop.eup %409 }
 0x109   :  { %v204_v42 = vmul.f32 %v410_v41, %v182_v39 }
 0x10a   :  { %v412_v44 = vpop.eup %411 }
 0x10b   :  { %v207_v43 = vadd.f32 %v205_v40, %v204_v42  ;;  %v209_v45 = vsub.f32 1.0, %v412_v44  ;;  %v211_v48 = vmul.f32 0.0, %v412_v44 }
 0x10d   :  { %413 = vtanh.f32 %v207_v43 }
 0x11a   :  { %v414_v46 = vpop.eup %413 }
 0x11b   :  { %v210_v47 = vmul.f32 %v414_v46, %v209_v45 }
 0x11d   :  { %v212_v49 = vadd.f32 %v211_v48, %v210_v47 }
 0x11f   :  { %v215_v50 = vpack.c.bf16 %v212_v49, %v212_v49 }
 0x121   :  { %249 = vmatmul.mubr.bf16.vlgmr.msra.gmra.mxu0 %v215_v50  ;;  %398 = vmatmul.mubr.bf16.vlgmr.msra.gmra.mxu1 %v215_v50 }
 0x1e1   :  { %v250_v52 = vpop.f32.mrf.mxu0  ;;  %v291_v53 = vpop.f32.mrf.mxu1 }
 0x1e2   :  { %v251_v54 = vadd.f32 %v250_v52, %v94_v15  ;;  %v292_v12 = vadd.f32 %v291_v53, %v102_v36 }
 0x1e3   :  { %v252_v55 = vpop.f32.mrf.mxu0  ;;  %v399_v56 = vpop.f32.mrf.mxu1 }
 0x1e4   :  { %v297_v57 = vadd.f32 %v340_v51, %v251_v54  ;;  %v253_v61 = vadd.f32 %v252_v55, %v98_v20 }
 0x1e5   :  { %v254_v58 = vpop.f32.mrf.mxu0  ;;  %v294_v59 = vpop.f32.mrf.mxu1 }
 0x1e6   :  { %v341_v60 = vmul.f32 -1.442695, %v297_v57  ;;  %v307_v1 = vadd.f32 %v305_v62, %v253_v61 }
 0x1e7   :  { %v255_v63 = vpop.f32.mrf.mxu0  ;;  %v400_v0 = vpop.f32.mrf.mxu1 }
 0x1e8   :  { %415 = vpow2.f32 %v341_v60  ;;  %v342_v2 = vmul.f32 -1.442695, %v307_v1 }
 0x1ea   :  { %417 = vpow2.f32 %v342_v2 }
 0x1f5   :  { %v416_v4 = vpop.eup %415 }
 0x1f6   :  { %v301_v5 = vadd.f32 1.0, %v416_v4 }
 0x1f7   :  { %v418_v6 = vpop.eup %417 }
 0x1f8   :  { %419 = vrcp.f32 %v301_v5  ;;  %v311_v11 = vadd.f32 1.0, %v418_v6 }
 0x1fa   :  { %421 = vrcp.f32 %v311_v11 }
 0x205   :  { %v420_v3 = vpop.eup %419 }
 0x206   :  { %v314_v8 = vmul.f32 %v420_v3, %v292_v12 }
 0x207   :  { %v422_v10 = vpop.eup %421 }
 0x208   :  { %v317_v9 = vadd.f32 %v315_v13, %v314_v8  ;;  %v319_v14 = vsub.f32 1.0, %v422_v10  ;;  %v321_v17 = vmul.f32 %v422_v10, %v212_v49 }
 0x20a   :  { %423 = vtanh.f32 %v317_v9 }
 0x217   :  { %v424_v15 = vpop.eup %423 }
 0x218   :  { %v320_v16 = vmul.f32 %v424_v15, %v319_v14 }
 0x21a   :  { %v322_v18 = vadd.f32 %v321_v17, %v320_v16 }
 0x21c   :  { %323 = vst [vmem:[#allocation2] sm:$0x3] %v322_v18 }
 0x21d   :  { %436 = shalt.err (!%p433_p4)
}
 0x21e   :  { %333 = dma.vmem_to_hbm [thread:$0]  %s331_s4, 32, %s710_s3, [#allocation3]  }
 0x21f   :  { %445 = dma.done.wait [#allocation3], 32  }
 0x220   :  { %446 = vsyncadd [#allocation3], 4294967264 }
 0x221   :  { %337 = vsyncpa [#allocation3], 1 }

</bundles_post_ra>
